<compile_context>
chip_gen: v7x
topology: tpu7x:2x2x1
jax: 0.10.0
libtpu: 0.0.40
codegen_flags: <defaults>
</compile_context>

<pallas_src>
import jax
import jax.numpy as jnp
from jax.experimental import pallas as pl
from jax.experimental.pallas import tpu as pltpu


# ---------------------------- small helpers ----------------------------

def _round_up(n, m):
    return -(-n // m) * m


def _vmem_specs(n):
    return [pl.BlockSpec(memory_space=pltpu.MemorySpace.VMEM) for _ in range(n)]


def _vmem_out():
    return pl.BlockSpec(memory_space=pltpu.MemorySpace.VMEM)


def _block_spec(shape, index_map, buffered=None):
    """BlockSpec, optionally multi-buffered (falls back if pipeline_mode unsupported)."""
    if buffered is not None:
        try:
            return pl.BlockSpec(shape, index_map, pipeline_mode=pl.Buffered(buffered))
        except Exception:
            pass
    return pl.BlockSpec(shape, index_map)


def _tpu_tile_config():
    """(tm_target, tk_target, vmem_limit_bytes) tuned per VMEM capacity."""
    vmem_bytes = None
    try:
        info = pltpu.get_tpu_info()
        vmem_bytes = getattr(info, "vmem_capacity_bytes", None)
    except Exception:
        vmem_bytes = None
    if vmem_bytes is not None and vmem_bytes >= 100 * 1024 * 1024:
        # v5e / v6e: 128 MiB physical VMEM -> bigger row/K tiles, bigger scoped budget.
        return 512, 2048, 96 * 1024 * 1024
    # v7x (64 MiB per TC) or unknown: conservative tiles.
    return 256, 1024, 48 * 1024 * 1024


def _dg_t(x, w):
    """x @ w^T by contracting the last axes (no wrapper-side transpose)."""
    return jax.lax.dot_general(
        x, w, dimension_numbers=(((1,), (1,)), ((), ())),
        preferred_element_type=jnp.float32)


# ---------------------------- Pallas kernels ----------------------------

def schema_and_weights(schema_x, a_norm, params, sel_src, sel_dst, bases_flat):
    """One pallas_call: SchemaGCN (pre-linear + GCN layers) AND the per-edge-type,
    per-layer dynamically-composed weights W_all = coeff_linear(comb) @ bases."""
    s = schema_x.shape[0]
    hidden = params["pre_w"].shape[0]
    n_gcn = len(params["gcn_layers"])
    e = sel_src.shape[0]
    wlen = bases_flat.shape[1]

    def kernel(*refs):
        x_ref, a_ref, pw_ref, pb_ref = refs[:4]
        gcn_refs = refs[4:4 + 2 * n_gcn]
        (cwl_ref, cwr_ref, cb_ref, ss_ref, sd_ref, bases_ref,
         feat_ref, ori_ref, wall_ref) = refs[4 + 2 * n_gcn:]

        h = _dg_t(x_ref[...], pw_ref[...]) + pb_ref[...]
        ori_ref[...] = h
        for l in range(n_gcn):
            hw = _dg_t(h, gcn_refs[2 * l][...])
            h = jnp.maximum(
                jnp.dot(a_ref[...], hw, preferred_element_type=jnp.float32)
                + gcn_refs[2 * l + 1][...], 0.0)
        feat_ref[...] = h

        # coeff_linear(cat(h[src], h[dst])) == h[src] @ Wc[:, :H]^T + h[dst] @ Wc[:, H:]^T + b
        # Row gathers are replaced by tiny one-hot selection matmuls (Mosaic-friendly).
        p = _dg_t(h, cwl_ref[...])                     # [S, B]
        q = _dg_t(h, cwr_ref[...])                     # [S, B]
        coeffs = (jnp.dot(ss_ref[...], p, preferred_element_type=jnp.float32)
                  + jnp.dot(sd_ref[...], q, preferred_element_type=jnp.float32)
                  + cb_ref[...])                       # [E, B]
        wall_ref[...] = jnp.dot(coeffs, bases_ref[...],
                                preferred_element_type=jnp.float32)

    coeff_w = params["coeff_w"]
    cwl = coeff_w[:, :hidden]
    cwr = coeff_w[:, hidden:]
    args = [schema_x, a_norm, params["pre_w"], params["pre_b"].reshape(1, -1)]
    for gw, gb in params["gcn_layers"]:
        args += [gw, gb.reshape(1, -1)]
    args += [cwl, cwr, params["coeff_b"].reshape(1, -1), sel_src, sel_dst, bases_flat]

    feat, ori, w_all = pl.pallas_call(
        kernel,
        out_shape=(jax.ShapeDtypeStruct((s, hidden), jnp.float32),
                   jax.ShapeDtypeStruct((s, hidden), jnp.float32),
                   jax.ShapeDtypeStruct((e, wlen), jnp.float32)),
        in_specs=_vmem_specs(len(args)),
        out_specs=(_vmem_out(), _vmem_out(), _vmem_out()),
    )(*args)
    return feat, ori, w_all


def src_transform(x_src, w, tr, out_dtype):
    """y = x_src @ W^T (W hoisted to the source side), gridded over source-row tiles.
    Output cast to out_dtype (bf16) so the fused layer streams bf16 operands."""
    n_pad, cp = x_src.shape

    def kernel(x_ref, w_ref, o_ref):
        o_ref[...] = _dg_t(x_ref[...], w_ref[...]).astype(o_ref.dtype)

    return pl.pallas_call(
        kernel,
        out_shape=jax.ShapeDtypeStruct((n_pad, cp), out_dtype),
        grid=(n_pad // tr,),
        in_specs=[pl.BlockSpec((tr, cp), lambda i: (i, 0)),
                  pl.BlockSpec((cp, cp), lambda i: (0, 0))],
        out_specs=pl.BlockSpec((tr, cp), lambda i: (i, 0)),
        compiler_params=pltpu.CompilerParams(dimension_semantics=("parallel",)),
    )(x_src, w)


def fused_sage_layer(a_cat, y_cat, x_dst, w_sum, b_sum, gamma, beta, mask,
                     *, tm, tk, c_real, vmem_limit):
    """acc = A_cat @ y_cat (K-tiled, f32 scratch accumulator); epilogue adds
    x_dst @ W_sum^T + b_sum and applies LayerNorm(mode='node', eps=1e-5) + ReLU."""
    n_pad, k_pad = a_cat.shape
    cp = x_dst.shape[1]
    grid = (n_pad // tm, k_pad // tk)
    inv_c = 1.0 / float(c_real)

    def kernel(a_ref, y_ref, xd_ref, w_ref, b_ref, g_ref, be_ref, m_ref,
               o_ref, acc_ref):
        k = pl.program_id(1)

        @pl.when(k == 0)
        def _():
            acc_ref[...] = jnp.zeros_like(acc_ref)

        acc_ref[...] += jnp.dot(a_ref[...], y_ref[...],
                                preferred_element_type=jnp.float32)

        @pl.when(k == pl.num_programs(1) - 1)
        def _():
            # x_dst contribution (shared-W fusion, Σ_e W_e) + Σ_e b_e, then LN + ReLU.
            z = _dg_t(xd_ref[...], w_ref[...])
            acc = acc_ref[...] + z + b_ref[...]
            # padded channels of acc are exactly zero (W/b/y zero-padded), so the
            # unmasked sum over cp equals the sum over the c_real real channels.
            mean = jnp.sum(acc, axis=-1, keepdims=True) * inv_c
            xc = (acc - mean) * m_ref[...]
            var = jnp.sum(xc * xc, axis=-1, keepdims=True) * inv_c
            yv = xc * jax.lax.rsqrt(var + 1e-5) * g_ref[...] + be_ref[...]
            o_ref[...] = jnp.maximum(yv, 0.0)

    itemsize_a = jnp.dtype(a_cat.dtype).itemsize
    itemsize_y = jnp.dtype(y_cat.dtype).itemsize
    n_row_tiles = n_pad // tm
    cost = pl.CostEstimate(
        flops=2 * n_pad * k_pad * cp + 2 * n_pad * cp * cp + 8 * n_pad * cp,
        transcendentals=n_pad,
        bytes_accessed=(n_pad * k_pad * itemsize_a
                        + n_row_tiles * k_pad * cp * itemsize_y
                        + 2 * n_pad * cp * 4 + cp * cp * 4))

    return pl.pallas_call(
        kernel,
        out_shape=jax.ShapeDtypeStruct((n_pad, cp), jnp.float32),
        grid=grid,
        in_specs=[
            _block_spec((tm, tk), lambda i, k: (i, k), buffered=3),  # A (dominant DMA)
            pl.BlockSpec((tk, cp), lambda i, k: (k, 0)),             # y (W-transformed src)
            pl.BlockSpec((tm, cp), lambda i, k: (i, 0)),             # x_dst (resident per i)
            pl.BlockSpec((cp, cp), lambda i, k: (0, 0)),             # Σ_e W_e
            pl.BlockSpec((1, cp), lambda i, k: (0, 0)),              # Σ_e b_e
            pl.BlockSpec((1, cp), lambda i, k: (0, 0)),              # gamma (zero-padded)
            pl.BlockSpec((1, cp), lambda i, k: (0, 0)),              # beta  (zero-padded)
            pl.BlockSpec((1, cp), lambda i, k: (0, 0)),              # LN channel mask
        ],
        out_specs=pl.BlockSpec((tm, cp), lambda i, k: (i, 0)),
        scratch_shapes=[pltpu.VMEM((tm, cp), jnp.float32)],
        compiler_params=pltpu.CompilerParams(
            dimension_semantics=("parallel", "arbitrary"),
            vmem_limit_bytes=vmem_limit),
        cost_estimate=cost,
    )(a_cat, y_cat, x_dst, w_sum, b_sum, gamma, beta, mask)


# -------------------- JAX glue (graph structure -> dense matrices) --------------------

def mean_agg_matrix(edge_index, num_src, num_dst):
    """Dense mean-aggregation matrix A[dst, src]; rows with no edges stay zero."""
    src, dst = edge_index[0], edge_index[1]
    a = jnp.zeros((num_dst, num_src), jnp.float32).at[dst, src].add(1.0)
    deg = jnp.clip(a.sum(axis=1, keepdims=True), 1.0, None)
    return a / deg


def gcn_norm_matrix(edge_index, num_nodes):
    """GCN D^-1/2 (A + I) D^-1/2; self-loops added only where missing
    (add_remaining_self_loops semantics)."""
    src, dst = edge_index[0], edge_index[1]
    a = jnp.zeros((num_nodes, num_nodes), jnp.float32).at[dst, src].add(1.0)
    diag = jnp.diagonal(a)
    a = a + jnp.diag(jnp.where(diag == 0.0, 1.0, 0.0))
    deg = a.sum(axis=1)
    dinv = jnp.where(deg > 0, 1.0 / jnp.sqrt(deg), 0.0)
    return a * dinv[:, None] * dinv[None, :]


# ---------------------------- Model ----------------------------

def init_params(key, node_types, edge_types, in_channels, schema_hidden,
                channels, num_bases, num_schema_layers, num_layers):
    ks = iter(jax.random.split(key, 64))

    def rnd(shape, scale=0.1):
        return scale * jax.random.normal(next(ks), shape, jnp.float32)

    return {
        "pre_w": rnd((schema_hidden, in_channels)),
        "pre_b": rnd((schema_hidden,)),
        "gcn_layers": [
            (rnd((schema_hidden, schema_hidden)), rnd((schema_hidden,)))
            for _ in range(num_schema_layers)
        ],
        "coeff_w": rnd((num_bases, 2 * schema_hidden)),
        "coeff_b": rnd((num_bases,)),
        "bases": [
            jax.random.normal(next(ks), (num_bases, channels, channels), jnp.float32)
            for _ in range(num_layers)
        ],
        "sage_bias": [
            {et: rnd((channels,)) for et in edge_types} for _ in range(num_layers)
        ],
        "ln": [
            {
                nt: (jnp.ones((channels,), jnp.float32),
                     jnp.zeros((channels,), jnp.float32))
                for nt in node_types
            }
            for _ in range(num_layers)
        ],
    }


def dynamic_coeff_hetero_sage_forward(params, x_dict, edge_index_dict,
                                      schema_x, schema_edge_index, table_to_index,
                                      *, agg_dtype=jnp.bfloat16):
    c = params["bases"][0].shape[-1]
    num_layers = len(params["bases"])
    cp = _round_up(c, 128)                       # lane-dense padded channel dim
    tm_target, tk_target, vmem_limit = _tpu_tile_config()

    edge_types = list(edge_index_dict.keys())
    edge_idx_of = {et: i for i, et in enumerate(edge_types)}
    num_tables = schema_x.shape[0]

    # ---- SchemaGCN + all coefficient weights (all edge types x all layers): ONE call ----
    a_schema = gcn_norm_matrix(schema_edge_index, num_tables)
    sel_src = jax.nn.one_hot(
        jnp.array([table_to_index[et[0]] for et in edge_types], jnp.int32),
        num_tables, dtype=jnp.float32)
    sel_dst = jax.nn.one_hot(
        jnp.array([table_to_index[et[2]] for et in edge_types], jnp.int32),
        num_tables, dtype=jnp.float32)
    bases_flat = jnp.stack([
        jnp.pad(b, ((0, 0), (0, cp - c), (0, cp - c))).reshape(b.shape[0], cp * cp)
        for b in params["bases"]
    ], axis=1).reshape(params["bases"][0].shape[0], -1)          # [B, L*cp*cp]
    schema_feat, ori_feat, w_all_flat = schema_and_weights(
        schema_x, a_schema, params, sel_src, sel_dst, bases_flat)
    w_all = w_all_flat.reshape(len(edge_types), num_layers, cp, cp)   # [E, L, cp, cp]

    # ---- node padding + mean-agg matrices (hoisted out of the layer loop) ----
    node_pad = {}
    for nt, x in x_dict.items():
        n8 = _round_up(x.shape[0], 8)
        tm = min(n8, tm_target)
        node_pad[nt] = (_round_up(n8, tm), tm, x.shape[0])

    cur = {nt: jnp.pad(x.astype(jnp.float32),
                       ((0, node_pad[nt][0] - x.shape[0]), (0, cp - c)))
           for nt, x in x_dict.items()}

    a_pad = {}
    for et, eidx in edge_index_dict.items():
        s_nt, _, d_nt = et
        a = mean_agg_matrix(eidx, x_dict[s_nt].shape[0], x_dict[d_nt].shape[0])
        a_pad[et] = jnp.pad(a, ((0, node_pad[d_nt][0] - a.shape[0]),
                                (0, node_pad[s_nt][0] - a.shape[1])))

    ln_mask = (jnp.arange(cp) < c).astype(jnp.float32).reshape(1, cp)

    # ---- hetero layers: per (layer, dst node type) ONE fused K-tiled pallas_call ----
    cat_cache = {}
    for layer in range(num_layers):
        active = [et for et in edge_types if et[0] in cur and et[2] in cur]
        by_dst = {}
        for et in active:
            by_dst.setdefault(et[2], []).append(et)

        new = {}
        for dst_nt, ets in by_dst.items():
            _, tm_d, _ = node_pad[dst_nt]

            key = (dst_nt, tuple(ets))
            if key not in cat_cache:   # A does not depend on the layer -> cached
                k_total = sum(node_pad[et[0]][0] for et in ets)
                tk = min(tk_target, _round_up(k_total, 128))
                k_pad = _round_up(k_total, tk)
                a_cat = jnp.concatenate([a_pad[et] for et in ets], axis=1)
                a_cat = jnp.pad(a_cat, ((0, 0), (0, k_pad - k_total))).astype(agg_dtype)
                cat_cache[key] = (a_cat, tk, k_pad, k_total)
            a_cat, tk, k_pad, k_total = cat_cache[key]

            # W hoisted to the source side: y_e = x_src @ W_e^T, streamed as bf16.
            ys, w_list = [], []
            b_sum = jnp.zeros((cp,), jnp.float32)
            for et in ets:
                w_e = w_all[edge_idx_of[et], layer]
                w_list.append(w_e)
                b_sum = b_sum + jnp.pad(params["sage_bias"][layer][et], (0, cp - c))
                ys.append(src_transform(cur[et[0]], w_e,
                                        node_pad[et[0]][1], agg_dtype))
            y_cat = jnp.concatenate(ys, axis=0)
            if k_pad > k_total:
                y_cat = jnp.pad(y_cat, ((0, k_pad - k_total), (0, 0)))
            w_sum = jnp.sum(jnp.stack(w_list, axis=0), axis=0)

            gamma, beta = params["ln"][layer][dst_nt]
            g = jnp.pad(gamma, (0, cp - c)).reshape(1, cp)
            be = jnp.pad(beta, (0, cp - c)).reshape(1, cp)

            new[dst_nt] = fused_sage_layer(
                a_cat, y_cat, cur[dst_nt], w_sum, b_sum.reshape(1, cp),
                g, be, ln_mask,
                tm=tm_d, tk=tk, c_real=c, vmem_limit=vmem_limit)
        cur = new  # HeteroConv semantics: only dst types that received messages survive

    out_dict = {nt: v[:node_pad[nt][2], :c] for nt, v in cur.items()}
    return out_dict, schema_feat, ori_feat, params["bases"]


# ---------------------------- Example run ----------------------------

if __name__ == "__main__":
    root = jax.random.PRNGKey(0)
    key_params, key_data = jax.random.split(root)

    node_types = ["users", "items"]
    edge_types = [("users", "rates", "items"), ("items", "rev_rates", "users")]
    in_channels, schema_hidden, channels = 8, 16, 32
    num_bases, num_schema_layers, num_layers = 8, 1, 2

    params = init_params(key_params, node_types, edge_types, in_channels,
                         schema_hidden, channels, num_bases, num_schema_layers,
                         num_layers)

    ks = iter(jax.random.split(key_data, 16))

    # schema graph: one node per table, bidirectional edge.
    schema_x = jax.random.normal(next(ks), (2, in_channels), jnp.float32)
    schema_edge_index = jnp.array([[0, 1], [1, 0]], dtype=jnp.int32)
    table_to_index = {"users": 0, "items": 1}

    n_users, n_items, n_edges = 16, 24, 48
    x_dict = {
        "users": jax.random.normal(next(ks), (n_users, channels), jnp.float32),
        "items": jax.random.normal(next(ks), (n_items, channels), jnp.float32),
    }
    e_src = jax.random.randint(next(ks), (n_edges,), 0, n_users)
    e_dst = jax.random.randint(next(ks), (n_edges,), 0, n_items)
    edge_index_dict = {
        ("users", "rates", "items"): jnp.stack([e_src, e_dst]),
        ("items", "rev_rates", "users"): jnp.stack([e_dst, e_src]),
    }

    out_dict, schema_feat, ori_feat, bases_list = dynamic_coeff_hetero_sage_forward(
        params, x_dict, edge_index_dict, schema_x, schema_edge_index, table_to_index
    )

    for v in out_dict.values():
        jax.block_until_ready(v)
    jax.block_until_ready(schema_feat)
    jax.block_until_ready(ori_feat)

    assert out_dict["users"].shape == (n_users, channels)
    assert out_dict["items"].shape == (n_items, channels)
    assert schema_feat.shape == (2, schema_hidden)
    print("KERNEL_OK")
</pallas_src>

<mosaic_0001>
module attributes {stable_mosaic.version = 11 : i64} {
  func.func @kernel(%arg0: memref<2x8xf32, #tpu.memory_space<vmem>>, %arg1: memref<2x2xf32, #tpu.memory_space<vmem>>, %arg2: memref<16x8xf32, #tpu.memory_space<vmem>>, %arg3: memref<1x16xf32, #tpu.memory_space<vmem>>, %arg4: memref<16x16xf32, #tpu.memory_space<vmem>>, %arg5: memref<1x16xf32, #tpu.memory_space<vmem>>, %arg6: memref<8x16xf32, #tpu.memory_space<vmem>>, %arg7: memref<8x16xf32, #tpu.memory_space<vmem>>, %arg8: memref<1x8xf32, #tpu.memory_space<vmem>>, %arg9: memref<2x2xf32, #tpu.memory_space<vmem>>, %arg10: memref<2x2xf32, #tpu.memory_space<vmem>>, %arg11: memref<8x32768xf32, #tpu.memory_space<vmem>>, %arg12: memref<2x16xf32, #tpu.memory_space<vmem>>, %arg13: memref<2x16xf32, #tpu.memory_space<vmem>>, %arg14: memref<2x32768xf32, #tpu.memory_space<vmem>>) attributes {dimension_semantics = [], scalar_prefetch = 0 : i64, scratch_operands = 0 : i64, tpu.core_type = #tpu.core_type<tc>} {
    %c0 = arith.constant 0 : index
    %c0_0 = arith.constant 0 : index
    %0 = vector.load %arg0[%c0, %c0_0] : memref<2x8xf32, #tpu.memory_space<vmem>>, vector<2x8xf32>
    %c0_1 = arith.constant 0 : index
    %c0_2 = arith.constant 0 : index
    %1 = vector.load %arg2[%c0_1, %c0_2] : memref<16x8xf32, #tpu.memory_space<vmem>>, vector<16x8xf32>
    %cst = arith.constant dense<0.000000e+00> : vector<2x16xf32>
    %2 = tpu.matmul %0, %1, %cst {dimension_numbers = #tpu.dot_dimension_numbers<[1], [1], [0], [0], [0, 0, 1, 0], [], []>} : vector<2x8xf32>, vector<16x8xf32>, vector<2x16xf32> -> vector<2x16xf32>
    %c0_3 = arith.constant 0 : index
    %c0_4 = arith.constant 0 : index
    %3 = vector.load %arg3[%c0_3, %c0_4] : memref<1x16xf32, #tpu.memory_space<vmem>>, vector<1x16xf32>
    %4 = vector.broadcast %3 : vector<1x16xf32> to vector<2x16xf32>
    %5 = arith.addf %2, %4 : vector<2x16xf32>
    %c0_5 = arith.constant 0 : index
    %c0_6 = arith.constant 0 : index
    %6 = vector.load %arg13[%c0_5, %c0_6] : memref<2x16xf32, #tpu.memory_space<vmem>>, vector<2x16xf32>
    tpu.vector_store %arg13[%c0_5, %c0_6], %5 {strides = array<i32>} : memref<2x16xf32, #tpu.memory_space<vmem>>, vector<2x16xf32>,
    %c0_7 = arith.constant 0 : index
    %c0_8 = arith.constant 0 : index
    %7 = vector.load %arg4[%c0_7, %c0_8] : memref<16x16xf32, #tpu.memory_space<vmem>>, vector<16x16xf32>
    %cst_9 = arith.constant dense<0.000000e+00> : vector<2x16xf32>
    %8 = tpu.matmul %5, %7, %cst_9 {dimension_numbers = #tpu.dot_dimension_numbers<[1], [1], [0], [0], [0, 0, 1, 0], [], []>} : vector<2x16xf32>, vector<16x16xf32>, vector<2x16xf32> -> vector<2x16xf32>
    %c0_10 = arith.constant 0 : index
    %c0_11 = arith.constant 0 : index
    %9 = vector.load %arg1[%c0_10, %c0_11] : memref<2x2xf32, #tpu.memory_space<vmem>>, vector<2x2xf32>
    %cst_12 = arith.constant dense<0.000000e+00> : vector<2x16xf32>
    %10 = tpu.matmul %9, %8, %cst_12 {dimension_numbers = #tpu.dot_dimension_numbers<[1], [0], [0], [1], [0, 0, 1, 1], [], []>} : vector<2x2xf32>, vector<2x16xf32>, vector<2x16xf32> -> vector<2x16xf32>
    %c0_13 = arith.constant 0 : index
    %c0_14 = arith.constant 0 : index
    %11 = vector.load %arg5[%c0_13, %c0_14] : memref<1x16xf32, #tpu.memory_space<vmem>>, vector<1x16xf32>
    %12 = vector.broadcast %11 : vector<1x16xf32> to vector<2x16xf32>
    %13 = arith.addf %10, %12 : vector<2x16xf32>
    %cst_15 = arith.constant 0.000000e+00 : f32
    %14 = vector.broadcast %cst_15 : f32 to vector<2x16xf32>
    %15 = arith.maximumf %13, %14 : vector<2x16xf32>
    %c0_16 = arith.constant 0 : index
    %c0_17 = arith.constant 0 : index
    %16 = vector.load %arg12[%c0_16, %c0_17] : memref<2x16xf32, #tpu.memory_space<vmem>>, vector<2x16xf32>
    tpu.vector_store %arg12[%c0_16, %c0_17], %15 {strides = array<i32>} : memref<2x16xf32, #tpu.memory_space<vmem>>, vector<2x16xf32>,
    %c0_18 = arith.constant 0 : index
    %c0_19 = arith.constant 0 : index
    %17 = vector.load %arg6[%c0_18, %c0_19] : memref<8x16xf32, #tpu.memory_space<vmem>>, vector<8x16xf32>
    %cst_20 = arith.constant dense<0.000000e+00> : vector<2x8xf32>
    %18 = tpu.matmul %15, %17, %cst_20 {dimension_numbers = #tpu.dot_dimension_numbers<[1], [1], [0], [0], [0, 0, 1, 0], [], []>} : vector<2x16xf32>, vector<8x16xf32>, vector<2x8xf32> -> vector<2x8xf32>
    %c0_21 = arith.constant 0 : index
    %c0_22 = arith.constant 0 : index
    %19 = vector.load %arg7[%c0_21, %c0_22] : memref<8x16xf32, #tpu.memory_space<vmem>>, vector<8x16xf32>
    %cst_23 = arith.constant dense<0.000000e+00> : vector<2x8xf32>
    %20 = tpu.matmul %15, %19, %cst_23 {dimension_numbers = #tpu.dot_dimension_numbers<[1], [1], [0], [0], [0, 0, 1, 0], [], []>} : vector<2x16xf32>, vector<8x16xf32>, vector<2x8xf32> -> vector<2x8xf32>
    %c0_24 = arith.constant 0 : index
    %c0_25 = arith.constant 0 : index
    %21 = vector.load %arg9[%c0_24, %c0_25] : memref<2x2xf32, #tpu.memory_space<vmem>>, vector<2x2xf32>
    %cst_26 = arith.constant dense<0.000000e+00> : vector<2x8xf32>
    %22 = tpu.matmul %21, %18, %cst_26 {dimension_numbers = #tpu.dot_dimension_numbers<[1], [0], [0], [1], [0, 0, 1, 1], [], []>} : vector<2x2xf32>, vector<2x8xf32>, vector<2x8xf32> -> vector<2x8xf32>
    %c0_27 = arith.constant 0 : index
    %c0_28 = arith.constant 0 : index
    %23 = vector.load %arg10[%c0_27, %c0_28] : memref<2x2xf32, #tpu.memory_space<vmem>>, vector<2x2xf32>
    %cst_29 = arith.constant dense<0.000000e+00> : vector<2x8xf32>
    %24 = tpu.matmul %23, %20, %cst_29 {dimension_numbers = #tpu.dot_dimension_numbers<[1], [0], [0], [1], [0, 0, 1, 1], [], []>} : vector<2x2xf32>, vector<2x8xf32>, vector<2x8xf32> -> vector<2x8xf32>
    %25 = arith.addf %22, %24 : vector<2x8xf32>
    %c0_30 = arith.constant 0 : index
    %c0_31 = arith.constant 0 : index
    %26 = vector.load %arg8[%c0_30, %c0_31] : memref<1x8xf32, #tpu.memory_space<vmem>>, vector<1x8xf32>
    %27 = vector.broadcast %26 : vector<1x8xf32> to vector<2x8xf32>
    %28 = arith.addf %25, %27 : vector<2x8xf32>
    %c0_32 = arith.constant 0 : index
    %c0_33 = arith.constant 0 : index
    %29 = vector.load %arg11[%c0_32, %c0_33] : memref<8x32768xf32, #tpu.memory_space<vmem>>, vector<8x32768xf32>
    %cst_34 = arith.constant dense<0.000000e+00> : vector<2x32768xf32>
    %30 = tpu.matmul %28, %29, %cst_34 {dimension_numbers = #tpu.dot_dimension_numbers<[1], [0], [0], [1], [0, 0, 1, 1], [], []>} : vector<2x8xf32>, vector<8x32768xf32>, vector<2x32768xf32> -> vector<2x32768xf32>
    %c0_35 = arith.constant 0 : index
    %c0_36 = arith.constant 0 : index
    %31 = vector.load %arg14[%c0_35, %c0_36] : memref<2x32768xf32, #tpu.memory_space<vmem>>, vector<2x32768xf32>
    tpu.vector_store %arg14[%c0_35, %c0_36], %30 {strides = array<i32>} : memref<2x32768xf32, #tpu.memory_space<vmem>>, vector<2x32768xf32>,
    return
  }
}

</mosaic_0001>

<bundles_post_ra>
// kernel: tpu_custom_call.1
= control target key start
LH: loop header
LB: loop body
LE: loop exit
PB: predicated region body
PF: predicated region fallthrough
CT: control target
= control target key end

     0   :  { %20 = vsyncpa [#allocation3], 0  ;;  %s12577_s0 = inlined_call_operand.vmem [shape: f32[2,8], index: 0, kind: input, shape index: {}]   ;;  %s12578_s1 = inlined_call_operand.hbm [shape: f32[2,2], index: 1, kind: input, shape index: {}]   ;;  %s12579_s2 = inlined_call_operand.vmem [shape: f32[16,8], index: 2, kind: input, shape index: {}]   ;;  %s12580_s3 = inlined_call_operand.vmem [shape: f32[1,16], index: 3, kind: input, shape index: {}]   ;;  %s12581_s4 = inlined_call_operand.vmem [shape: f32[16,16], index: 4, kind: input, shape index: {}]   ;;  %s12582_s5 = inlined_call_operand.vmem [shape: f32[1,16], index: 5, kind: input, shape index: {}]   ;;  %s12583_s6 = inlined_call_operand.vmem [shape: f32[8,16], index: 6, kind: input, shape index: {}]   ;;  %s12584_s7 = inlined_call_operand.vmem [shape: f32[8,16], index: 7, kind: input, shape index: {}]   ;;  %s12585_s8 = inlined_call_operand.vmem [shape: f32[1,8], index: 8, kind: input, shape index: {}]   ;;  %s12586_s9 = inlined_call_operand.vmem [shape: f32[2,2], index: 9, kind: input, shape index: {}]   ;;  %s12587_s10 = inlined_call_operand.vmem [shape: f32[2,2], index: 10, kind: input, shape index: {}]   ;;  %s12588_s11 = inlined_call_operand.hbm [shape: f32[8,32768], index: 11, kind: input, shape index: {}]   ;;  %s12589_s12 = inlined_call_operand.hbm [shape: f32[2,16], index: 12, kind: output, shape index: {0}]   ;;  %s12590_s13 = inlined_call_operand.hbm [shape: f32[2,16], index: 13, kind: output, shape index: {1}]   ;;  %s12591_s14 = inlined_call_operand.hbm [shape: f32[2,32768], index: 14, kind: output, shape index: {2}]  }
   0x1   :  { %21 = vsyncpa [#allocation6], 0 }
   0x2   :  { %22 = vsyncpa [#allocation4], 0 }
   0x3   :  { %23 = vsyncpa [#allocation9], 0  ;;  %s11844_s29 = smov [#allocation2]   ;;  %s11845_s15 = smov [#allocation5]  }
   0x4   :  { %s32_s30 = sshll.u32 %s11844_s29, 4  ;;  %s60_s16 = sshll.u32 %s11845_s15, 4  ;;  %s33_s30 = int_to_ptr.vmem [resolvable:$true] %s32_s30  ;;  %s61_s16 = int_to_ptr.vmem [resolvable:$true] %s60_s16 }
   0x5   :  { %s11726_s19 = scalar_lea.hbm %s12578_s1, 32 }
   0x6   :  { %p11727_p0 = scmp.ne.s32.totalorder %s12578_s1, %s11726_s19  ;;  %p11730_p1 = scmp.lt.u32.totalorder %s11726_s19, %s12578_s1 }
   0x8   :  { %p11732_p2 = pnand %p11730_p1, %p11727_p0 }
   0xa   :  { %11735 = shalt.err (!%p11732_p2)
}
   0xb   :  { %s11736_s24 = scalar_lea.vmem %s33_s30, 32  ;;  %p11741_p4 = scmp.lt.s32.totalorder %s33_s30, %s33_s30 }
   0xc   :  { %p11737_p3 = scmp.ne.s32.totalorder %s33_s30, %s11736_s24  ;;  %p11742_p5 = scmp.lt.s32.totalorder %s11736_s24, %s11736_s24 }
   0xe   :  { %p11743_p6 = por %p11742_p5, %p11741_p4 }
  0x10   :  { %p11744_p7 = pnand %p11743_p6, %p11737_p3 }
  0x12   :  { %11747 = shalt.err (!%p11744_p7)
}
  0x13   :  { %35 = dma.hbm_to_vmem [thread:$0]  %s12578_s1, 32, %s33_s30, [#allocation3]  }
  0x14   :  { %s11748_s29 = scalar_lea.hbm %s12588_s11, 32768 }
  0x15   :  { %p11749_p8 = scmp.ne.s32.totalorder %s12588_s11, %s11748_s29  ;;  %p11752_p9 = scmp.lt.u32.totalorder %s11748_s29, %s12588_s11 }
  0x17   :  { %p11754_p10 = pnand %p11752_p9, %p11749_p8 }
  0x19   :  { %11757 = shalt.err (!%p11754_p10)
}
  0x1a   :  { %s11758_s20 = scalar_lea.vmem %s61_s16, 32768  ;;  %p11763_p12 = scmp.lt.s32.totalorder %s61_s16, %s61_s16 }
  0x1b   :  { %p11759_p11 = scmp.ne.s32.totalorder %s61_s16, %s11758_s20  ;;  %p11764_p13 = scmp.lt.s32.totalorder %s11758_s20, %s11758_s20 }
  0x1d   :  { %p11765_p0 = por %p11764_p13, %p11763_p12 }
  0x1f   :  { %p11766_p1 = pnand %p11765_p0, %p11759_p11 }
  0x21   :  { %11769 = shalt.err (!%p11766_p1)
}
  0x22   :  { %63 = dma.hbm_to_vmem [thread:$0]  %s12588_s11, 32768, %s61_s16, [#allocation6]  }
  0x23   :  { %11836 = dma.done.wait [#allocation3], 32  }
  0x24   :  { %11837 = vsyncadd [#allocation3], 4294967264 }
  0x25   :  { %11838 = dma.done.wait [#allocation6], 32768  }
  0x26   :  { %11839 = vsyncadd [#allocation6], 4294934528  ;;  %v11846_v0 = vmov 0.0|0.0   ;;  %vm11847_vm0 = vmmov 0   ;;  %v11848_v1 = vmov 0.0   ;;  %vm80_vm1 = vcmask 64512  }
  0x27   :  { %11709 = vmatprep.subr.bf16.mxu0 %v11846_v0  ;;  %11674 = vmatprep.mubr.msk.f32.mxu0 %vm11847_vm0, %v11848_v1  ;;  %vm164_vm2 = vcmask 130048   ;;  %v71_v2 = vld [vmem:[%s12579_s2] sm:$0xff]  ;;  %v72_v3 = vld [vmem:[%s12579_s2 + $0x8] sm:$0xff]  ;;  %vm11711_vm3 = vmpackc.low %vm80_vm1, %vm80_vm1  ;;  %vm160_vm5 = vcmask 123904   ;;  %vm256_vm6 = vcmask 1041408   ;;  %vm252_vm7 = vcmask 15360  }
  0x28   :  { %11713 = vmatprep.subr.bf16.mxu1 %v11846_v0  ;;  %11681 = vmatprep.mubr.msk.f32.mxu1 %vm11847_vm0, %v11848_v1  ;;  %v11710_v4 = vpack.c.bf16 %v72_v3, %v71_v2  ;;  %v162_v5 = vld [vmem:[%s12581_s4] sm:$0xff]  ;;  %v163_v6 = vld [vmem:[%s12581_s4 + $0x8] sm:$0xff]  ;;  %vm11715_vm4 = vmpackc.low %vm164_vm2, %vm164_vm2  ;;  %s11851_s1 = smov [#allocation7]  }
  0x29   :  { %v11714_v7 = vpack.c.bf16 %v163_v6, %v162_v5  ;;  %v70_v8 = vld [vmem:[%s12577_s0] sm:$0x3]  ;;  %v646_v29 = vld [vmem:[#allocation5 + $0x8] sm:$0xff]  ;;  %v645_v31 = vld [vmem:[#allocation5] sm:$0xff]  ;;  %s11470_s30 = sshll.u32 %s11851_s1, 4  ;;  %s11471_s30 = int_to_ptr.vmem [resolvable:$true] %s11470_s30 }
  0x2a   :  { %11712 = vmatpush3.bf16.xpose.msk.msra.mxu0 %vm11711_vm3, %v11710_v4  ;;  %v11507_v9 = vld [vmem:[%s12580_s3] ss:$0 sm:$0xff]  ;;  %v647_v32 = vld [vmem:[#allocation5 + $0x10] sm:$0xff]  ;;  %v650_v33 = vld [vmem:[#allocation5 + $0x28] sm:$0xff] }
  0x2b   :  { %11716 = vmatpush3.bf16.xpose.msk.msra.mxu1 %vm11715_vm4, %v11714_v7  ;;  %11684 = vmatprep.subr.mxu0 %v11848_v1  ;;  %v244_v13 = vld [vmem:[#allocation2] sm:$0x3]  ;;  %v649_v42 = vld [vmem:[#allocation5 + $0x20] sm:$0xff]  ;;  %v651_v43 = vld [vmem:[#allocation5 + $0x30] sm:$0xff] }
  0x2c   :  { %11689 = vmatprep.subr.mxu1 %v11848_v1  ;;  %v332_v16 = vld [vmem:[%s12583_s6] sm:$0xff]  ;;  %v654_v44 = vld [vmem:[#allocation5 + $0x48] sm:$0xff]  ;;  %v655_v47 = vld [vmem:[#allocation5 + $0x50] sm:$0xff] }
  0x2d   :  { %v409_v17 = vld [vmem:[%s12584_s7] sm:$0xff]  ;;  %v658_v48 = vld [vmem:[#allocation5 + $0x68] sm:$0xff]  ;;  %v659_v51 = vld [vmem:[#allocation5 + $0x70] sm:$0xff] }
  0x2e   :  { %v11514_v18 = vld [vmem:[%s12582_s5] ss:$0 sm:$0xff]  ;;  %v653_v46 = vld [vmem:[#allocation5 + $0x40] sm:$0xff]  ;;  %v662_v52 = vld [vmem:[#allocation5 + $0x88] sm:$0xff] }
  0x2f   :  { %v484_v23 = vld [vmem:[%s12587_s10] sm:$0x3]  ;;  %v657_v50 = vld [vmem:[#allocation5 + $0x60] sm:$0xff]  ;;  %v663_v55 = vld [vmem:[#allocation5 + $0x90] sm:$0xff] }
  0x30   :  { %v483_v24 = vld [vmem:[%s12586_s9] sm:$0x3]  ;;  %v661_v54 = vld [vmem:[#allocation5 + $0x80] sm:$0xff]  ;;  %v666_v56 = vld [vmem:[#allocation5 + $0xa8] sm:$0xff] }
  0x31   :  { %11675 = vmatmul.mubr.msk.f32.vlgmr.msra.gmra.mrb[0].mxu0 %vm80_vm1, %v70_v8  ;;  %v648_v30 = vld [vmem:[#allocation5 + $0x18] sm:$0xff]  ;;  %v665_v58 = vld [vmem:[#allocation5 + $0xa0] sm:$0xff]  ;;  %v667_v59 = vld [vmem:[#allocation5 + $0xb0] sm:$0xff] }
  0x32   :  { %11686 = vmatprep.mubr.msk.f32.mxu0 %vm11847_vm0, %v11848_v1  ;;  %v652_v34 = vld [vmem:[#allocation5 + $0x38] sm:$0xff]  ;;  %v670_v60 = vld [vmem:[#allocation5 + $0xc8] sm:$0xff]  ;;  %v669_v62 = vld [vmem:[#allocation5 + $0xc0] sm:$0xff] }
  0x33   :  { %v11525_v37 = vld [vmem:[%s12585_s8] ss:$0 sm:$0xff]  ;;  %v671_v63 = vld [vmem:[#allocation5 + $0xd0] sm:$0xff]  ;;  %v674_v0 = vld [vmem:[#allocation5 + $0xe8] sm:$0xff]  ;;  %s11850_s8 = smov [#allocation8]  }
  0x34   :  { %v656_v45 = vld [vmem:[#allocation5 + $0x58] sm:$0xff]  ;;  %v673_v3 = vld [vmem:[#allocation5 + $0xe0] sm:$0xff]  ;;  %v675_v4 = vld [vmem:[#allocation5 + $0xf0] sm:$0xff]  ;;  %s11480_s20 = sshll.u32 %s11850_s8, 4  ;;  %s11481_s20 = int_to_ptr.vmem [resolvable:$true] %s11480_s20 }
  0x35   :  { %v660_v49 = vld [vmem:[#allocation5 + $0x78] sm:$0xff]  ;;  %v678_v5 = vld [vmem:[#allocation5 + $0x108] sm:$0xff]  ;;  %v677_v7 = vld [vmem:[#allocation5 + $0x100] sm:$0xff]  ;;  %s11770_s21 = scalar_lea.vmem %s11481_s20, 32  ;;  %p11775_p3 = scmp.lt.s32.totalorder %s11481_s20, %s11481_s20 }
  0x36   :  { %v664_v53 = vld [vmem:[#allocation5 + $0x98] sm:$0xff]  ;;  %v679_v8 = vld [vmem:[#allocation5 + $0x110] sm:$0xff]  ;;  %p11771_p2 = scmp.ne.s32.totalorder %s11481_s20, %s11770_s21  ;;  %p11776_p4 = scmp.lt.s32.totalorder %s11770_s21, %s11770_s21 }
  0x37   :  { %v668_v57 = vld [vmem:[#allocation5 + $0xb8] sm:$0xff] }
  0x38   :  { %v672_v61 = vld [vmem:[#allocation5 + $0xd8] sm:$0xff]  ;;  %p11777_p5 = por %p11776_p4, %p11775_p3 }
  0x39   :  { %v676_v2 = vld [vmem:[#allocation5 + $0xf8] sm:$0xff] }
  0x3a   :  { %v680_v6 = vld [vmem:[#allocation5 + $0x118] sm:$0xff]  ;;  %p11778_p6 = pnand %p11777_p5, %p11771_p2 }
 0x104   :  { %v156_v10 = vpop.f32.mrb[0].mxu0 }
 0x105   :  { %v157_v11 = vadd.f32 %v11507_v9, %v156_v10  ;;  %v11676_v12 = vpop.f32.mrb[1].mxu0  ;;  %v682_v9 = vld [vmem:[#allocation5 + $0x128] sm:$0xff]  ;;  %v684_v10 = vld [vmem:[#allocation5 + $0x138] sm:$0xff] }
 0x106   :  { %v683_v12 = vld [vmem:[#allocation5 + $0x130] sm:$0xff] }
 0x107   :  { %11682 = vmatmul.mubr.msk.f32.vlgmr.msra.gmra.mrb[0].mxu1 %vm164_vm2, %v157_v11  ;;  %161 = vst.msk [vmem:[#allocation8] sm:$0x3] %vm160_vm5, %v157_v11  ;;  %v681_v11 = vld [vmem:[#allocation5 + $0x120] sm:$0xff] }
 0x108   :  { %11691 = vmatprep.mubr.msk.f32.mxu1 %vm11847_vm0, %v11848_v1  ;;  %11690 = vmatpush3.xpose.msk.msra.mxu1 %vm164_vm2, %v332_v16  ;;  %v687_v16 = vld [vmem:[#allocation5 + $0x150] sm:$0xff] }
 0x109   :  { %11699 = vmatprep.subr.mxu1 %v11848_v1 }
 0x1da   :  { %v240_v14 = vpop.f32.mrb[0].mxu1 }
 0x1db   :  { %v11683_v15 = vpop.f32.mrb[1].mxu1  ;;  %11685 = vmatpush3.msk.msra.mxu0 %vm256_vm6, %v240_v14  ;;  %v688_v14 = vld [vmem:[#allocation5 + $0x158] sm:$0xff] }
 0x1dc   :  { %11687 = vmatmul.mubr.msk.f32.vlgmr.msra.gmra.mrb[2].mxu0 %vm252_vm7, %v244_v13  ;;  %11694 = vmatprep.subr.mxu0 %v11848_v1  ;;  %v686_v13 = vld [vmem:[#allocation5 + $0x148] sm:$0xff]  ;;  %v685_v15 = vld [vmem:[#allocation5 + $0x140] sm:$0xff] }
 0x1dd   :  { %11696 = vmatprep.mubr.msk.f32.mxu0 %vm11847_vm0, %v11848_v1 }
 0x1e2   :  { %11695 = vmatpush3.xpose.msk.msra.mxu0 %vm164_vm2, %v409_v17  ;;  %v690_v17 = vld [vmem:[#allocation5 + $0x168] sm:$0xff] }
 0x1e3   :  { %11704 = vmatprep.subr.mxu0 %v11848_v1 }
 0x2af   :  { %v326_v19 = vpop.f32.mrb[2].mxu0 }
 0x2b0   :  { %v327_v20 = vadd.f32 %v11514_v18, %v326_v19  ;;  %v11688_v21 = vpop.f32.mrb[3].mxu0  ;;  %v692_v18 = vld [vmem:[#allocation5 + $0x178] sm:$0xff]  ;;  %v689_v19 = vld [vmem:[#allocation5 + $0x160] sm:$0xff] }
 0x2b1   :  { %v694_v21 = vld [vmem:[#allocation5 + $0x188] sm:$0xff] }
 0x2b2   :  { %v330_v22 = vmax.f32 %v327_v20, 0.0  ;;  %v691_v20 = vld [vmem:[#allocation5 + $0x170] sm:$0xff] }
 0x2b4   :  { %11692 = vmatmul.mubr.msk.f32.vlgmr.msra.gmra.mrb[2].mxu1 %vm164_vm2, %v330_v22  ;;  %11697 = vmatmul.mubr.msk.f32.vlgmr.msra.gmra.mrb[4].mxu0 %vm164_vm2, %v330_v22  ;;  %331 = vst.msk [vmem:[#allocation7] sm:$0x3] %vm160_vm5, %v330_v22  ;;  %v696_v22 = vld [vmem:[#allocation5 + $0x198] sm:$0xff] }
 0x2b5   :  { %11701 = vmatprep.mubr.msk.f32.mxu1 %vm11847_vm0, %v11848_v1  ;;  %11706 = vmatprep.mubr.msk.f32.mxu0 %vm11847_vm0, %v11848_v1 }
 0x387   :  { %v405_v25 = vpop.f32.mrb[2].mxu1  ;;  %v479_v26 = vpop.f32.mrb[4].mxu0 }
 0x388   :  { %v11693_v27 = vpop.f32.mrb[3].mxu1  ;;  %v11698_v28 = vpop.f32.mrb[5].mxu0  ;;  %11700 = vmatpush3.msk.msra.mxu1 %vm256_vm6, %v479_v26  ;;  %11705 = vmatpush3.msk.msra.mxu0 %vm256_vm6, %v405_v25  ;;  %v698_v25 = vld [vmem:[#allocation5 + $0x1a8] sm:$0xff]  ;;  %v700_v26 = vld [vmem:[#allocation5 + $0x1b8] sm:$0xff] }
 0x389   :  { %11702 = vmatmul.mubr.msk.f32.vlgmr.msra.gmra.mrb[4].mxu1 %vm252_vm7, %v484_v23  ;;  %11707 = vmatmul.mubr.msk.f32.vlgmr.msra.gmra.mrb[6].mxu0 %vm252_vm7, %v483_v24  ;;  %v693_v23 = vld [vmem:[#allocation5 + $0x180] sm:$0xff]  ;;  %v695_v24 = vld [vmem:[#allocation5 + $0x190] sm:$0xff] }
 0x38a   :  { %968 = vmatprep.mubr.f32.mxu1 %v11848_v1  ;;  %1039 = vmatprep.mubr.f32.mxu0 %v11848_v1  ;;  %v697_v27 = vld [vmem:[#allocation5 + $0x1a0] sm:$0xff]  ;;  %v699_v28 = vld [vmem:[#allocation5 + $0x1b0] sm:$0xff] }
 0x38b   :  { %904 = vmatprep.subr.mxu1 %v646_v29  ;;  %975 = vmatprep.subr.mxu0 %v648_v30  ;;  %v702_v29 = vld [vmem:[#allocation5 + $0x1c8] sm:$0xff]  ;;  %v704_v30 = vld [vmem:[#allocation5 + $0x1d8] sm:$0xff] }
 0x38c   :  { %905 = vmatpush1.msra.mxu1 %v645_v31  ;;  %976 = vmatpush1.msra.mxu0 %v647_v32  ;;  %v701_v31 = vld [vmem:[#allocation5 + $0x1c0] sm:$0xff]  ;;  %v703_v32 = vld [vmem:[#allocation5 + $0x1d0] sm:$0xff] }
 0x38d   :  { %1046 = vmatprep.subr.mxu1 %v650_v33  ;;  %1117 = vmatprep.subr.mxu0 %v652_v34  ;;  %v706_v33 = vld [vmem:[#allocation5 + $0x1e8] sm:$0xff]  ;;  %v708_v34 = vld [vmem:[#allocation5 + $0x1f8] sm:$0xff] }
 0x45c   :  { %v557_v35 = vpop.f32.mrb[4].mxu1  ;;  %v633_v36 = vpop.f32.mrb[6].mxu0 }
 0x45d   :  { %v634_v38 = vadd.f32 %v633_v36, %v557_v35  ;;  %v11703_v39 = vpop.f32.mrb[5].mxu1  ;;  %v11708_v40 = vpop.f32.mrb[7].mxu0  ;;  %v705_v35 = vld [vmem:[#allocation5 + $0x1e0] sm:$0xff]  ;;  %v707_v36 = vld [vmem:[#allocation5 + $0x1f0] sm:$0xff] }
 0x45e   :  { %v709_v39 = vld [vmem:[#allocation5 + $0x200] sm:$0xff]  ;;  %v711_v40 = vld [vmem:[#allocation5 + $0x210] sm:$0xff] }
 0x45f   :  { %v12027_v41 = vadd.f32 %v11525_v37, %v634_v38  ;;  %v710_v37 = vld [vmem:[#allocation5 + $0x208] sm:$0xff]  ;;  %v712_v38 = vld [vmem:[#allocation5 + $0x218] sm:$0xff] }
 0x461   :  { %11526 = vmatmul.mubr.msk.f32.vlgmr.msra.gmra.mrb[6].mxu1 %vm80_vm1, %v12027_v41  ;;  %11527 = vmatmul.mubr.msk.f32.vlgmr.msra.gmra.mrb[8].mxu0 %vm80_vm1, %v12027_v41 }
 0x462   :  { %1047 = vmatpush1.msra.mxu1 %v649_v42  ;;  %1110 = vmatprep.mubr.f32.mxu1 %v11848_v1  ;;  %v714_v42 = vld [vmem:[#allocation5 + $0x228] sm:$0xff] }
 0x463   :  { %1118 = vmatpush1.msra.mxu0 %v651_v43  ;;  %1181 = vmatprep.mubr.f32.mxu0 %v11848_v1  ;;  %v716_v43 = vld [vmem:[#allocation5 + $0x238] sm:$0xff] }
 0x464   :  { %1188 = vmatprep.subr.mxu1 %v654_v44  ;;  %1259 = vmatprep.subr.mxu0 %v656_v45  ;;  %v713_v44 = vld [vmem:[#allocation5 + $0x220] sm:$0xff]  ;;  %v715_v45 = vld [vmem:[#allocation5 + $0x230] sm:$0xff] }
 0x465   :  { %11528 = vmatmul.mubr.msk.f32.vlgmr.msra.gmra.mrb[8].mxu1 %vm80_vm1, %v12027_v41  ;;  %11529 = vmatmul.mubr.msk.f32.vlgmr.msra.gmra.mrb[10].mxu0 %vm80_vm1, %v12027_v41 }
 0x466   :  { %1189 = vmatpush1.msra.mxu1 %v653_v46  ;;  %1252 = vmatprep.mubr.f32.mxu1 %v11848_v1  ;;  %v718_v46 = vld [vmem:[#allocation5 + $0x248] sm:$0xff] }
 0x467   :  { %1260 = vmatpush1.msra.mxu0 %v655_v47  ;;  %1323 = vmatprep.mubr.f32.mxu0 %v11848_v1  ;;  %v720_v47 = vld [vmem:[#allocation5 + $0x258] sm:$0xff] }
 0x468   :  { %1330 = vmatprep.subr.mxu1 %v658_v48  ;;  %1401 = vmatprep.subr.mxu0 %v660_v49  ;;  %v717_v48 = vld [vmem:[#allocation5 + $0x240] sm:$0xff]  ;;  %v719_v49 = vld [vmem:[#allocation5 + $0x250] sm:$0xff] }
 0x469   :  { %11530 = vmatmul.mubr.msk.f32.vlgmr.msra.gmra.mrb[10].mxu1 %vm80_vm1, %v12027_v41  ;;  %11531 = vmatmul.mubr.msk.f32.vlgmr.msra.gmra.mrb[12].mxu0 %vm80_vm1, %v12027_v41 }
 0x46a   :  { %1331 = vmatpush1.msra.mxu1 %v657_v50  ;;  %1394 = vmatprep.mubr.f32.mxu1 %v11848_v1  ;;  %v722_v50 = vld [vmem:[#allocation5 + $0x268] sm:$0xff] }
 0x46b   :  { %1402 = vmatpush1.msra.mxu0 %v659_v51  ;;  %1465 = vmatprep.mubr.f32.mxu0 %v11848_v1  ;;  %v724_v51 = vld [vmem:[#allocation5 + $0x278] sm:$0xff] }
 0x46c   :  { %1472 = vmatprep.subr.mxu1 %v662_v52  ;;  %1543 = vmatprep.subr.mxu0 %v664_v53  ;;  %v721_v52 = vld [vmem:[#allocation5 + $0x260] sm:$0xff]  ;;  %v723_v53 = vld [vmem:[#allocation5 + $0x270] sm:$0xff] }
 0x46d   :  { %11532 = vmatmul.mubr.msk.f32.vlgmr.msra.gmra.mrb[12].mxu1 %vm80_vm1, %v12027_v41  ;;  %11533 = vmatmul.mubr.msk.f32.vlgmr.msra.gmra.mrb[14].mxu0 %vm80_vm1, %v12027_v41 }
 0x46e   :  { %1473 = vmatpush1.msra.mxu1 %v661_v54  ;;  %1536 = vmatprep.mubr.f32.mxu1 %v11848_v1  ;;  %v726_v54 = vld [vmem:[#allocation5 + $0x288] sm:$0xff] }
 0x46f   :  { %1544 = vmatpush1.msra.mxu0 %v663_v55  ;;  %1607 = vmatprep.mubr.f32.mxu0 %v11848_v1  ;;  %v728_v55 = vld [vmem:[#allocation5 + $0x298] sm:$0xff] }
 0x470   :  { %1614 = vmatprep.subr.mxu1 %v666_v56  ;;  %1685 = vmatprep.subr.mxu0 %v668_v57  ;;  %v725_v56 = vld [vmem:[#allocation5 + $0x280] sm:$0xff]  ;;  %v727_v57 = vld [vmem:[#allocation5 + $0x290] sm:$0xff] }
 0x471   :  { %11534 = vmatmul.mubr.msk.f32.vlgmr.msra.gmra.mrb[14].mxu1 %vm80_vm1, %v12027_v41  ;;  %11535 = vmatmul.mubr.msk.f32.vlgmr.msra.gmra.mrb[16].mxu0 %vm80_vm1, %v12027_v41 }
 0x472   :  { %1615 = vmatpush1.msra.mxu1 %v665_v58  ;;  %1678 = vmatprep.mubr.f32.mxu1 %v11848_v1  ;;  %v730_v58 = vld [vmem:[#allocation5 + $0x2a8] sm:$0xff] }
 0x473   :  { %1686 = vmatpush1.msra.mxu0 %v667_v59  ;;  %1749 = vmatprep.mubr.f32.mxu0 %v11848_v1  ;;  %v732_v59 = vld [vmem:[#allocation5 + $0x2b8] sm:$0xff] }
 0x474   :  { %1756 = vmatprep.subr.mxu1 %v670_v60  ;;  %1827 = vmatprep.subr.mxu0 %v672_v61  ;;  %v729_v60 = vld [vmem:[#allocation5 + $0x2a0] sm:$0xff]  ;;  %v731_v61 = vld [vmem:[#allocation5 + $0x2b0] sm:$0xff] }
 0x475   :  { %11536 = vmatmul.mubr.msk.f32.vlgmr.msra.gmra.mrb[16].mxu1 %vm80_vm1, %v12027_v41  ;;  %11537 = vmatmul.mubr.msk.f32.vlgmr.msra.gmra.mrb[18].mxu0 %vm80_vm1, %v12027_v41 }
 0x476   :  { %1757 = vmatpush1.msra.mxu1 %v669_v62  ;;  %1820 = vmatprep.mubr.f32.mxu1 %v11848_v1  ;;  %v734_v62 = vld [vmem:[#allocation5 + $0x2c8] sm:$0xff] }
 0x477   :  { %1828 = vmatpush1.msra.mxu0 %v671_v63  ;;  %1891 = vmatprep.mubr.f32.mxu0 %v11848_v1  ;;  %v736_v63 = vld [vmem:[#allocation5 + $0x2d8] sm:$0xff] }
 0x478   :  { %1898 = vmatprep.subr.mxu1 %v674_v0  ;;  %1969 = vmatprep.subr.mxu0 %v676_v2  ;;  %v733_v0 = vld [vmem:[#allocation5 + $0x2c0] sm:$0xff]  ;;  %v735_v2 = vld [vmem:[#allocation5 + $0x2d0] sm:$0xff] }
 0x479   :  { %11538 = vmatmul.mubr.msk.f32.vlgmr.msra.gmra.mrb[18].mxu1 %vm80_vm1, %v12027_v41  ;;  %11539 = vmatmul.mubr.msk.f32.vlgmr.msra.gmra.mrb[20].mxu0 %vm80_vm1, %v12027_v41 }
 0x47a   :  { %1899 = vmatpush1.msra.mxu1 %v673_v3  ;;  %1962 = vmatprep.mubr.f32.mxu1 %v11848_v1  ;;  %v738_v3 = vld [vmem:[#allocation5 + $0x2e8] sm:$0xff] }
 0x47b   :  { %1970 = vmatpush1.msra.mxu0 %v675_v4  ;;  %2033 = vmatprep.mubr.f32.mxu0 %v11848_v1  ;;  %v740_v4 = vld [vmem:[#allocation5 + $0x2f8] sm:$0xff] }
 0x47c   :  { %2040 = vmatprep.subr.mxu1 %v678_v5  ;;  %2111 = vmatprep.subr.mxu0 %v680_v6  ;;  %v737_v5 = vld [vmem:[#allocation5 + $0x2e0] sm:$0xff]  ;;  %v739_v6 = vld [vmem:[#allocation5 + $0x2f0] sm:$0xff] }
 0x47d   :  { %11540 = vmatmul.mubr.msk.f32.vlgmr.msra.gmra.mrb[20].mxu1 %vm80_vm1, %v12027_v41  ;;  %11541 = vmatmul.mubr.msk.f32.vlgmr.msra.gmra.mrb[22].mxu0 %vm80_vm1, %v12027_v41 }
 0x47e   :  { %2041 = vmatpush1.msra.mxu1 %v677_v7  ;;  %2104 = vmatprep.mubr.f32.mxu1 %v11848_v1  ;;  %v742_v7 = vld [vmem:[#allocation5 + $0x308] sm:$0xff] }
 0x47f   :  { %2112 = vmatpush1.msra.mxu0 %v679_v8  ;;  %2175 = vmatprep.mubr.f32.mxu0 %v11848_v1  ;;  %v744_v8 = vld [vmem:[#allocation5 + $0x318] sm:$0xff] }
 0x480   :  { %2182 = vmatprep.subr.mxu1 %v682_v9  ;;  %2253 = vmatprep.subr.mxu0 %v684_v10  ;;  %v741_v9 = vld [vmem:[#allocation5 + $0x300] sm:$0xff]  ;;  %v743_v10 = vld [vmem:[#allocation5 + $0x310] sm:$0xff] }
 0x481   :  { %11542 = vmatmul.mubr.msk.f32.vlgmr.msra.gmra.mrb[22].mxu1 %vm80_vm1, %v12027_v41  ;;  %11543 = vmatmul.mubr.msk.f32.vlgmr.msra.gmra.mrb[24].mxu0 %vm80_vm1, %v12027_v41 }
 0x482   :  { %2183 = vmatpush1.msra.mxu1 %v681_v11  ;;  %2246 = vmatprep.mubr.f32.mxu1 %v11848_v1  ;;  %v746_v11 = vld [vmem:[#allocation5 + $0x328] sm:$0xff] }
 0x483   :  { %2254 = vmatpush1.msra.mxu0 %v683_v12  ;;  %2317 = vmatprep.mubr.f32.mxu0 %v11848_v1  ;;  %v748_v12 = vld [vmem:[#allocation5 + $0x338] sm:$0xff] }
 0x484   :  { %2324 = vmatprep.subr.mxu1 %v686_v13  ;;  %2395 = vmatprep.subr.mxu0 %v688_v14  ;;  %v745_v13 = vld [vmem:[#allocation5 + $0x320] sm:$0xff]  ;;  %v747_v14 = vld [vmem:[#allocation5 + $0x330] sm:$0xff] }
 0x485   :  { %11544 = vmatmul.mubr.msk.f32.vlgmr.msra.gmra.mrb[24].mxu1 %vm80_vm1, %v12027_v41  ;;  %11545 = vmatmul.mubr.msk.f32.vlgmr.msra.gmra.mrb[26].mxu0 %vm80_vm1, %v12027_v41 }
 0x486   :  { %2325 = vmatpush1.msra.mxu1 %v685_v15  ;;  %2388 = vmatprep.mubr.f32.mxu1 %v11848_v1  ;;  %v750_v15 = vld [vmem:[#allocation5 + $0x348] sm:$0xff] }
 0x487   :  { %2396 = vmatpush1.msra.mxu0 %v687_v16  ;;  %2459 = vmatprep.mubr.f32.mxu0 %v11848_v1  ;;  %v752_v16 = vld [vmem:[#allocation5 + $0x358] sm:$0xff] }
 0x488   :  { %2466 = vmatprep.subr.mxu1 %v690_v17  ;;  %2537 = vmatprep.subr.mxu0 %v692_v18  ;;  %v749_v17 = vld [vmem:[#allocation5 + $0x340] sm:$0xff]  ;;  %v751_v18 = vld [vmem:[#allocation5 + $0x350] sm:$0xff] }
 0x489   :  { %11546 = vmatmul.mubr.msk.f32.vlgmr.msra.gmra.mrb[26].mxu1 %vm80_vm1, %v12027_v41  ;;  %11547 = vmatmul.mubr.msk.f32.vlgmr.msra.gmra.mrb[28].mxu0 %vm80_vm1, %v12027_v41 }
 0x48a   :  { %2467 = vmatpush1.msra.mxu1 %v689_v19  ;;  %2530 = vmatprep.mubr.f32.mxu1 %v11848_v1  ;;  %v754_v19 = vld [vmem:[#allocation5 + $0x368] sm:$0xff] }
 0x48b   :  { %2538 = vmatpush1.msra.mxu0 %v691_v20  ;;  %2601 = vmatprep.mubr.f32.mxu0 %v11848_v1  ;;  %v756_v20 = vld [vmem:[#allocation5 + $0x378] sm:$0xff] }
 0x48c   :  { %2608 = vmatprep.subr.mxu1 %v694_v21  ;;  %2679 = vmatprep.subr.mxu0 %v696_v22  ;;  %v753_v21 = vld [vmem:[#allocation5 + $0x360] sm:$0xff]  ;;  %v755_v22 = vld [vmem:[#allocation5 + $0x370] sm:$0xff] }
 0x48d   :  { %11548 = vmatmul.mubr.msk.f32.vlgmr.msra.gmra.mrb[28].mxu1 %vm80_vm1, %v12027_v41  ;;  %11549 = vmatmul.mubr.msk.f32.vlgmr.msra.gmra.mrb[30].mxu0 %vm80_vm1, %v12027_v41 }
 0x48e   :  { %2609 = vmatpush1.msra.mxu1 %v693_v23  ;;  %2672 = vmatprep.mubr.f32.mxu1 %v11848_v1  ;;  %v758_v23 = vld [vmem:[#allocation5 + $0x388] sm:$0xff] }
 0x48f   :  { %2680 = vmatpush1.msra.mxu0 %v695_v24  ;;  %2743 = vmatprep.mubr.f32.mxu0 %v11848_v1  ;;  %v760_v24 = vld [vmem:[#allocation5 + $0x398] sm:$0xff] }
 0x490   :  { %2750 = vmatprep.subr.mxu1 %v698_v25  ;;  %2821 = vmatprep.subr.mxu0 %v700_v26  ;;  %v757_v25 = vld [vmem:[#allocation5 + $0x380] sm:$0xff]  ;;  %v759_v26 = vld [vmem:[#allocation5 + $0x390] sm:$0xff] }
 0x491   :  { %11550 = vmatmul.mubr.msk.f32.vlgmr.msra.gmra.mrb[30].mxu1 %vm80_vm1, %v12027_v41  ;;  %11551 = vmatmul.mubr.msk.f32.vlgmr.msra.gmra.mrb[32].mxu0 %vm80_vm1, %v12027_v41 }
 0x492   :  { %2751 = vmatpush1.msra.mxu1 %v697_v27  ;;  %2814 = vmatprep.mubr.f32.mxu1 %v11848_v1  ;;  %v762_v27 = vld [vmem:[#allocation5 + $0x3a8] sm:$0xff] }
 0x493   :  { %2822 = vmatpush1.msra.mxu0 %v699_v28  ;;  %2885 = vmatprep.mubr.f32.mxu0 %v11848_v1  ;;  %v764_v28 = vld [vmem:[#allocation5 + $0x3b8] sm:$0xff] }
 0x494   :  { %2892 = vmatprep.subr.mxu1 %v702_v29  ;;  %2963 = vmatprep.subr.mxu0 %v704_v30  ;;  %v761_v29 = vld [vmem:[#allocation5 + $0x3a0] sm:$0xff]  ;;  %v763_v30 = vld [vmem:[#allocation5 + $0x3b0] sm:$0xff] }
 0x495   :  { %11552 = vmatmul.mubr.msk.f32.vlgmr.msra.gmra.mrb[32].mxu1 %vm80_vm1, %v12027_v41  ;;  %11553 = vmatmul.mubr.msk.f32.vlgmr.msra.gmra.mrb[34].mxu0 %vm80_vm1, %v12027_v41 }
 0x496   :  { %2893 = vmatpush1.msra.mxu1 %v701_v31  ;;  %2956 = vmatprep.mubr.f32.mxu1 %v11848_v1  ;;  %v766_v31 = vld [vmem:[#allocation5 + $0x3c8] sm:$0xff] }
 0x497   :  { %2964 = vmatpush1.msra.mxu0 %v703_v32  ;;  %3027 = vmatprep.mubr.f32.mxu0 %v11848_v1  ;;  %v768_v32 = vld [vmem:[#allocation5 + $0x3d8] sm:$0xff] }
 0x498   :  { %3034 = vmatprep.subr.mxu1 %v706_v33  ;;  %3105 = vmatprep.subr.mxu0 %v708_v34  ;;  %v765_v33 = vld [vmem:[#allocation5 + $0x3c0] sm:$0xff]  ;;  %v767_v34 = vld [vmem:[#allocation5 + $0x3d0] sm:$0xff] }
 0x499   :  { %11554 = vmatmul.mubr.msk.f32.vlgmr.msra.gmra.mrb[34].mxu1 %vm80_vm1, %v12027_v41  ;;  %11555 = vmatmul.mubr.msk.f32.vlgmr.msra.gmra.mrb[36].mxu0 %vm80_vm1, %v12027_v41 }
 0x49a   :  { %3035 = vmatpush1.msra.mxu1 %v705_v35  ;;  %3098 = vmatprep.mubr.f32.mxu1 %v11848_v1  ;;  %v770_v35 = vld [vmem:[#allocation5 + $0x3e8] sm:$0xff] }
 0x49b   :  { %3106 = vmatpush1.msra.mxu0 %v707_v36  ;;  %3169 = vmatprep.mubr.f32.mxu0 %v11848_v1  ;;  %v772_v36 = vld [vmem:[#allocation5 + $0x3f8] sm:$0xff] }
 0x49c   :  { %3176 = vmatprep.subr.mxu1 %v710_v37  ;;  %3247 = vmatprep.subr.mxu0 %v712_v38  ;;  %v769_v37 = vld [vmem:[#allocation5 + $0x3e0] sm:$0xff]  ;;  %v771_v38 = vld [vmem:[#allocation5 + $0x3f0] sm:$0xff] }
 0x49d   :  { %11556 = vmatmul.mubr.msk.f32.vlgmr.msra.gmra.mrb[36].mxu1 %vm80_vm1, %v12027_v41  ;;  %11557 = vmatmul.mubr.msk.f32.vlgmr.msra.gmra.mrb[38].mxu0 %vm80_vm1, %v12027_v41 }
 0x49e   :  { %3177 = vmatpush1.msra.mxu1 %v709_v39  ;;  %3240 = vmatprep.mubr.f32.mxu1 %v11848_v1  ;;  %v774_v39 = vld [vmem:[#allocation5 + $0x408] sm:$0xff] }
 0x49f   :  { %3248 = vmatpush1.msra.mxu0 %v711_v40  ;;  %3311 = vmatprep.mubr.f32.mxu0 %v11848_v1  ;;  %v776_v40 = vld [vmem:[#allocation5 + $0x418] sm:$0xff] }
 0x4a0   :  { %3318 = vmatprep.subr.mxu1 %v714_v42  ;;  %3389 = vmatprep.subr.mxu0 %v716_v43  ;;  %v773_v42 = vld [vmem:[#allocation5 + $0x400] sm:$0xff]  ;;  %v775_v43 = vld [vmem:[#allocation5 + $0x410] sm:$0xff] }
 0x4a1   :  { %11558 = vmatmul.mubr.msk.f32.vlgmr.msra.gmra.mrb[38].mxu1 %vm80_vm1, %v12027_v41  ;;  %11559 = vmatmul.mubr.msk.f32.vlgmr.msra.gmra.mrb[40].mxu0 %vm80_vm1, %v12027_v41 }
 0x4a2   :  { %3319 = vmatpush1.msra.mxu1 %v713_v44  ;;  %3382 = vmatprep.mubr.f32.mxu1 %v11848_v1  ;;  %v778_v44 = vld [vmem:[#allocation5 + $0x428] sm:$0xff] }
 0x4a3   :  { %3390 = vmatpush1.msra.mxu0 %v715_v45  ;;  %3453 = vmatprep.mubr.f32.mxu0 %v11848_v1  ;;  %v780_v45 = vld [vmem:[#allocation5 + $0x438] sm:$0xff] }
 0x4a4   :  { %3460 = vmatprep.subr.mxu1 %v718_v46  ;;  %3531 = vmatprep.subr.mxu0 %v720_v47  ;;  %v777_v46 = vld [vmem:[#allocation5 + $0x420] sm:$0xff]  ;;  %v779_v47 = vld [vmem:[#allocation5 + $0x430] sm:$0xff] }
 0x4a5   :  { %11560 = vmatmul.mubr.msk.f32.vlgmr.msra.gmra.mrb[40].mxu1 %vm80_vm1, %v12027_v41  ;;  %11561 = vmatmul.mubr.msk.f32.vlgmr.msra.gmra.mrb[42].mxu0 %vm80_vm1, %v12027_v41 }
 0x4a6   :  { %3461 = vmatpush1.msra.mxu1 %v717_v48  ;;  %3524 = vmatprep.mubr.f32.mxu1 %v11848_v1  ;;  %v782_v48 = vld [vmem:[#allocation5 + $0x448] sm:$0xff] }
 0x4a7   :  { %3532 = vmatpush1.msra.mxu0 %v719_v49  ;;  %3595 = vmatprep.mubr.f32.mxu0 %v11848_v1  ;;  %v784_v49 = vld [vmem:[#allocation5 + $0x458] sm:$0xff] }
 0x4a8   :  { %3602 = vmatprep.subr.mxu1 %v722_v50  ;;  %3673 = vmatprep.subr.mxu0 %v724_v51  ;;  %v781_v50 = vld [vmem:[#allocation5 + $0x440] sm:$0xff]  ;;  %v783_v51 = vld [vmem:[#allocation5 + $0x450] sm:$0xff] }
 0x4a9   :  { %11562 = vmatmul.mubr.msk.f32.vlgmr.msra.gmra.mrb[42].mxu1 %vm80_vm1, %v12027_v41  ;;  %11563 = vmatmul.mubr.msk.f32.vlgmr.msra.gmra.mrb[44].mxu0 %vm80_vm1, %v12027_v41 }
 0x4aa   :  { %3603 = vmatpush1.msra.mxu1 %v721_v52  ;;  %3666 = vmatprep.mubr.f32.mxu1 %v11848_v1  ;;  %v786_v52 = vld [vmem:[#allocation5 + $0x468] sm:$0xff] }
 0x4ab   :  { %3674 = vmatpush1.msra.mxu0 %v723_v53  ;;  %3737 = vmatprep.mubr.f32.mxu0 %v11848_v1  ;;  %v788_v53 = vld [vmem:[#allocation5 + $0x478] sm:$0xff] }
 0x4ac   :  { %3744 = vmatprep.subr.mxu1 %v726_v54  ;;  %3815 = vmatprep.subr.mxu0 %v728_v55  ;;  %v785_v54 = vld [vmem:[#allocation5 + $0x460] sm:$0xff]  ;;  %v787_v55 = vld [vmem:[#allocation5 + $0x470] sm:$0xff] }
 0x4ad   :  { %11564 = vmatmul.mubr.msk.f32.vlgmr.msra.gmra.mrb[44].mxu1 %vm80_vm1, %v12027_v41  ;;  %11565 = vmatmul.mubr.msk.f32.vlgmr.msra.gmra.mrb[46].mxu0 %vm80_vm1, %v12027_v41 }
 0x4ae   :  { %3745 = vmatpush1.msra.mxu1 %v725_v56  ;;  %3808 = vmatprep.mubr.f32.mxu1 %v11848_v1  ;;  %v790_v56 = vld [vmem:[#allocation5 + $0x488] sm:$0xff] }
 0x4af   :  { %3816 = vmatpush1.msra.mxu0 %v727_v57  ;;  %3879 = vmatprep.mubr.f32.mxu0 %v11848_v1  ;;  %v792_v57 = vld [vmem:[#allocation5 + $0x498] sm:$0xff] }
 0x4b0   :  { %3886 = vmatprep.subr.mxu1 %v730_v58  ;;  %3957 = vmatprep.subr.mxu0 %v732_v59  ;;  %v789_v58 = vld [vmem:[#allocation5 + $0x480] sm:$0xff]  ;;  %v791_v59 = vld [vmem:[#allocation5 + $0x490] sm:$0xff] }
 0x4b1   :  { %11566 = vmatmul.mubr.msk.f32.vlgmr.msra.gmra.mrb[46].mxu1 %vm80_vm1, %v12027_v41  ;;  %11567 = vmatmul.mubr.msk.f32.vlgmr.msra.gmra.mrb[48].mxu0 %vm80_vm1, %v12027_v41 }
 0x4b2   :  { %3887 = vmatpush1.msra.mxu1 %v729_v60  ;;  %3950 = vmatprep.mubr.f32.mxu1 %v11848_v1  ;;  %v794_v60 = vld [vmem:[#allocation5 + $0x4a8] sm:$0xff] }
 0x4b3   :  { %3958 = vmatpush1.msra.mxu0 %v731_v61  ;;  %4021 = vmatprep.mubr.f32.mxu0 %v11848_v1  ;;  %v796_v61 = vld [vmem:[#allocation5 + $0x4b8] sm:$0xff] }
 0x4b4   :  { %4028 = vmatprep.subr.mxu1 %v734_v62  ;;  %4099 = vmatprep.subr.mxu0 %v736_v63  ;;  %v793_v62 = vld [vmem:[#allocation5 + $0x4a0] sm:$0xff]  ;;  %v795_v63 = vld [vmem:[#allocation5 + $0x4b0] sm:$0xff] }
 0x4b5   :  { %11568 = vmatmul.mubr.msk.f32.vlgmr.msra.gmra.mrb[48].mxu1 %vm80_vm1, %v12027_v41  ;;  %11569 = vmatmul.mubr.msk.f32.vlgmr.msra.gmra.mrb[50].mxu0 %vm80_vm1, %v12027_v41 }
 0x4b6   :  { %4029 = vmatpush1.msra.mxu1 %v733_v0  ;;  %4092 = vmatprep.mubr.f32.mxu1 %v11848_v1  ;;  %v798_v0 = vld [vmem:[#allocation5 + $0x4c8] sm:$0xff] }
 0x4b7   :  { %4100 = vmatpush1.msra.mxu0 %v735_v2  ;;  %4163 = vmatprep.mubr.f32.mxu0 %v11848_v1  ;;  %v800_v2 = vld [vmem:[#allocation5 + $0x4d8] sm:$0xff] }
 0x4b8   :  { %4170 = vmatprep.subr.mxu1 %v738_v3  ;;  %4241 = vmatprep.subr.mxu0 %v740_v4  ;;  %v797_v3 = vld [vmem:[#allocation5 + $0x4c0] sm:$0xff]  ;;  %v799_v4 = vld [vmem:[#allocation5 + $0x4d0] sm:$0xff] }
 0x4b9   :  { %11570 = vmatmul.mubr.msk.f32.vlgmr.msra.gmra.mrb[50].mxu1 %vm80_vm1, %v12027_v41  ;;  %11571 = vmatmul.mubr.msk.f32.vlgmr.msra.gmra.mrb[52].mxu0 %vm80_vm1, %v12027_v41 }
 0x4ba   :  { %4171 = vmatpush1.msra.mxu1 %v737_v5  ;;  %4234 = vmatprep.mubr.f32.mxu1 %v11848_v1  ;;  %v802_v5 = vld [vmem:[#allocation5 + $0x4e8] sm:$0xff] }
 0x4bb   :  { %4242 = vmatpush1.msra.mxu0 %v739_v6  ;;  %4305 = vmatprep.mubr.f32.mxu0 %v11848_v1  ;;  %v804_v6 = vld [vmem:[#allocation5 + $0x4f8] sm:$0xff] }
 0x4bc   :  { %4312 = vmatprep.subr.mxu1 %v742_v7  ;;  %4383 = vmatprep.subr.mxu0 %v744_v8  ;;  %v801_v7 = vld [vmem:[#allocation5 + $0x4e0] sm:$0xff]  ;;  %v803_v8 = vld [vmem:[#allocation5 + $0x4f0] sm:$0xff] }
 0x4bd   :  { %11572 = vmatmul.mubr.msk.f32.vlgmr.msra.gmra.mrb[52].mxu1 %vm80_vm1, %v12027_v41  ;;  %11573 = vmatmul.mubr.msk.f32.vlgmr.msra.gmra.mrb[54].mxu0 %vm80_vm1, %v12027_v41 }
 0x4be   :  { %4313 = vmatpush1.msra.mxu1 %v741_v9  ;;  %4376 = vmatprep.mubr.f32.mxu1 %v11848_v1  ;;  %v806_v9 = vld [vmem:[#allocation5 + $0x508] sm:$0xff] }
 0x4bf   :  { %4384 = vmatpush1.msra.mxu0 %v743_v10  ;;  %4447 = vmatprep.mubr.f32.mxu0 %v11848_v1  ;;  %v808_v10 = vld [vmem:[#allocation5 + $0x518] sm:$0xff] }
 0x4c0   :  { %4454 = vmatprep.subr.mxu1 %v746_v11  ;;  %4525 = vmatprep.subr.mxu0 %v748_v12  ;;  %v805_v11 = vld [vmem:[#allocation5 + $0x500] sm:$0xff]  ;;  %v807_v12 = vld [vmem:[#allocation5 + $0x510] sm:$0xff] }
 0x4c1   :  { %11574 = vmatmul.mubr.msk.f32.vlgmr.msra.gmra.mrb[54].mxu1 %vm80_vm1, %v12027_v41  ;;  %11575 = vmatmul.mubr.msk.f32.vlgmr.msra.gmra.mrb[56].mxu0 %vm80_vm1, %v12027_v41 }
 0x4c2   :  { %4455 = vmatpush1.msra.mxu1 %v745_v13  ;;  %4518 = vmatprep.mubr.f32.mxu1 %v11848_v1  ;;  %v810_v13 = vld [vmem:[#allocation5 + $0x528] sm:$0xff] }
 0x4c3   :  { %4526 = vmatpush1.msra.mxu0 %v747_v14  ;;  %4589 = vmatprep.mubr.f32.mxu0 %v11848_v1  ;;  %v812_v14 = vld [vmem:[#allocation5 + $0x538] sm:$0xff] }
 0x4c4   :  { %4596 = vmatprep.subr.mxu1 %v750_v15  ;;  %4667 = vmatprep.subr.mxu0 %v752_v16  ;;  %v809_v15 = vld [vmem:[#allocation5 + $0x520] sm:$0xff]  ;;  %v811_v16 = vld [vmem:[#allocation5 + $0x530] sm:$0xff] }
 0x4c5   :  { %11576 = vmatmul.mubr.msk.f32.vlgmr.msra.gmra.mrb[56].mxu1 %vm80_vm1, %v12027_v41  ;;  %11577 = vmatmul.mubr.msk.f32.vlgmr.msra.gmra.mrb[58].mxu0 %vm80_vm1, %v12027_v41 }
 0x4c6   :  { %4597 = vmatpush1.msra.mxu1 %v749_v17  ;;  %4660 = vmatprep.mubr.f32.mxu1 %v11848_v1  ;;  %v814_v17 = vld [vmem:[#allocation5 + $0x548] sm:$0xff] }
 0x4c7   :  { %4668 = vmatpush1.msra.mxu0 %v751_v18  ;;  %4731 = vmatprep.mubr.f32.mxu0 %v11848_v1  ;;  %v816_v18 = vld [vmem:[#allocation5 + $0x558] sm:$0xff] }
 0x4c8   :  { %4738 = vmatprep.subr.mxu1 %v754_v19  ;;  %4809 = vmatprep.subr.mxu0 %v756_v20  ;;  %v813_v19 = vld [vmem:[#allocation5 + $0x540] sm:$0xff]  ;;  %v815_v20 = vld [vmem:[#allocation5 + $0x550] sm:$0xff] }
 0x4c9   :  { %11578 = vmatmul.mubr.msk.f32.vlgmr.msra.gmra.mrb[58].mxu1 %vm80_vm1, %v12027_v41  ;;  %11579 = vmatmul.mubr.msk.f32.vlgmr.msra.gmra.mrb[60].mxu0 %vm80_vm1, %v12027_v41 }
 0x4ca   :  { %4739 = vmatpush1.msra.mxu1 %v753_v21  ;;  %4802 = vmatprep.mubr.f32.mxu1 %v11848_v1  ;;  %v818_v21 = vld [vmem:[#allocation5 + $0x568] sm:$0xff] }
 0x4cb   :  { %4810 = vmatpush1.msra.mxu0 %v755_v22  ;;  %4873 = vmatprep.mubr.f32.mxu0 %v11848_v1  ;;  %v820_v22 = vld [vmem:[#allocation5 + $0x578] sm:$0xff] }
 0x4cc   :  { %4880 = vmatprep.subr.mxu1 %v758_v23  ;;  %4951 = vmatprep.subr.mxu0 %v760_v24  ;;  %v817_v23 = vld [vmem:[#allocation5 + $0x560] sm:$0xff]  ;;  %v819_v24 = vld [vmem:[#allocation5 + $0x570] sm:$0xff] }
 0x4cd   :  { %11580 = vmatmul.mubr.msk.f32.vlgmr.msra.gmra.mrb[60].mxu1 %vm80_vm1, %v12027_v41  ;;  %11581 = vmatmul.mubr.msk.f32.vlgmr.msra.gmra.mrb[62].mxu0 %vm80_vm1, %v12027_v41 }
 0x4ce   :  { %4881 = vmatpush1.msra.mxu1 %v757_v25  ;;  %4944 = vmatprep.mubr.f32.mxu1 %v11848_v1  ;;  %v822_v25 = vld [vmem:[#allocation5 + $0x588] sm:$0xff] }
 0x4cf   :  { %4952 = vmatpush1.msra.mxu0 %v759_v26  ;;  %5015 = vmatprep.mubr.f32.mxu0 %v11848_v1  ;;  %v824_v26 = vld [vmem:[#allocation5 + $0x598] sm:$0xff] }
 0x4d0   :  { %5022 = vmatprep.subr.mxu1 %v762_v27  ;;  %5093 = vmatprep.subr.mxu0 %v764_v28  ;;  %v821_v27 = vld [vmem:[#allocation5 + $0x580] sm:$0xff]  ;;  %v823_v28 = vld [vmem:[#allocation5 + $0x590] sm:$0xff] }
 0x4d1   :  { %11582 = vmatmul.mubr.msk.f32.vlgmr.msra.gmra.mrb[62].mxu1 %vm80_vm1, %v12027_v41  ;;  %11583 = vmatmul.mubr.msk.f32.vlgmr.msra.gmra.mrb[64].mxu0 %vm80_vm1, %v12027_v41 }
 0x4d2   :  { %5023 = vmatpush1.msra.mxu1 %v761_v29  ;;  %5086 = vmatprep.mubr.f32.mxu1 %v11848_v1  ;;  %v826_v29 = vld [vmem:[#allocation5 + $0x5a8] sm:$0xff] }
 0x4d3   :  { %5094 = vmatpush1.msra.mxu0 %v763_v30  ;;  %5157 = vmatprep.mubr.f32.mxu0 %v11848_v1  ;;  %v828_v30 = vld [vmem:[#allocation5 + $0x5b8] sm:$0xff] }
 0x4d4   :  { %5164 = vmatprep.subr.mxu1 %v766_v31  ;;  %5235 = vmatprep.subr.mxu0 %v768_v32  ;;  %v825_v31 = vld [vmem:[#allocation5 + $0x5a0] sm:$0xff]  ;;  %v827_v32 = vld [vmem:[#allocation5 + $0x5b0] sm:$0xff] }
 0x4d5   :  { %11584 = vmatmul.mubr.msk.f32.vlgmr.msra.gmra.mrb[64].mxu1 %vm80_vm1, %v12027_v41  ;;  %11585 = vmatmul.mubr.msk.f32.vlgmr.msra.gmra.mrb[66].mxu0 %vm80_vm1, %v12027_v41 }
 0x4d6   :  { %5165 = vmatpush1.msra.mxu1 %v765_v33  ;;  %5228 = vmatprep.mubr.f32.mxu1 %v11848_v1  ;;  %v830_v33 = vld [vmem:[#allocation5 + $0x5c8] sm:$0xff] }
 0x4d7   :  { %5236 = vmatpush1.msra.mxu0 %v767_v34  ;;  %5299 = vmatprep.mubr.f32.mxu0 %v11848_v1  ;;  %v832_v34 = vld [vmem:[#allocation5 + $0x5d8] sm:$0xff] }
 0x4d8   :  { %5306 = vmatprep.subr.mxu1 %v770_v35  ;;  %5377 = vmatprep.subr.mxu0 %v772_v36  ;;  %v829_v35 = vld [vmem:[#allocation5 + $0x5c0] sm:$0xff]  ;;  %v831_v36 = vld [vmem:[#allocation5 + $0x5d0] sm:$0xff] }
 0x4d9   :  { %11586 = vmatmul.mubr.msk.f32.vlgmr.msra.gmra.mrb[66].mxu1 %vm80_vm1, %v12027_v41  ;;  %11587 = vmatmul.mubr.msk.f32.vlgmr.msra.gmra.mrb[68].mxu0 %vm80_vm1, %v12027_v41 }
 0x4da   :  { %5307 = vmatpush1.msra.mxu1 %v769_v37  ;;  %5370 = vmatprep.mubr.f32.mxu1 %v11848_v1  ;;  %v834_v37 = vld [vmem:[#allocation5 + $0x5e8] sm:$0xff] }
 0x4db   :  { %5378 = vmatpush1.msra.mxu0 %v771_v38  ;;  %5441 = vmatprep.mubr.f32.mxu0 %v11848_v1  ;;  %v836_v38 = vld [vmem:[#allocation5 + $0x5f8] sm:$0xff] }
 0x4dc   :  { %5448 = vmatprep.subr.mxu1 %v774_v39  ;;  %5519 = vmatprep.subr.mxu0 %v776_v40  ;;  %v833_v39 = vld [vmem:[#allocation5 + $0x5e0] sm:$0xff]  ;;  %v835_v40 = vld [vmem:[#allocation5 + $0x5f0] sm:$0xff] }
 0x4dd   :  { %11588 = vmatmul.mubr.msk.f32.vlgmr.msra.gmra.mrb[68].mxu1 %vm80_vm1, %v12027_v41  ;;  %11589 = vmatmul.mubr.msk.f32.vlgmr.msra.gmra.mrb[70].mxu0 %vm80_vm1, %v12027_v41 }
 0x4de   :  { %5449 = vmatpush1.msra.mxu1 %v773_v42  ;;  %5512 = vmatprep.mubr.f32.mxu1 %v11848_v1  ;;  %v838_v42 = vld [vmem:[#allocation5 + $0x608] sm:$0xff] }
 0x4df   :  { %5520 = vmatpush1.msra.mxu0 %v775_v43  ;;  %5583 = vmatprep.mubr.f32.mxu0 %v11848_v1  ;;  %v840_v43 = vld [vmem:[#allocation5 + $0x618] sm:$0xff] }
 0x4e0   :  { %5590 = vmatprep.subr.mxu1 %v778_v44  ;;  %5661 = vmatprep.subr.mxu0 %v780_v45  ;;  %v837_v44 = vld [vmem:[#allocation5 + $0x600] sm:$0xff]  ;;  %v839_v45 = vld [vmem:[#allocation5 + $0x610] sm:$0xff] }
 0x4e1   :  { %11590 = vmatmul.mubr.msk.f32.vlgmr.msra.gmra.mrb[70].mxu1 %vm80_vm1, %v12027_v41  ;;  %11591 = vmatmul.mubr.msk.f32.vlgmr.msra.gmra.mrb[72].mxu0 %vm80_vm1, %v12027_v41 }
 0x4e2   :  { %5591 = vmatpush1.msra.mxu1 %v777_v46  ;;  %5654 = vmatprep.mubr.f32.mxu1 %v11848_v1  ;;  %v842_v46 = vld [vmem:[#allocation5 + $0x628] sm:$0xff] }
 0x4e3   :  { %5662 = vmatpush1.msra.mxu0 %v779_v47  ;;  %5725 = vmatprep.mubr.f32.mxu0 %v11848_v1  ;;  %v844_v47 = vld [vmem:[#allocation5 + $0x638] sm:$0xff] }
 0x4e4   :  { %5732 = vmatprep.subr.mxu1 %v782_v48  ;;  %5803 = vmatprep.subr.mxu0 %v784_v49  ;;  %v841_v48 = vld [vmem:[#allocation5 + $0x620] sm:$0xff]  ;;  %v843_v49 = vld [vmem:[#allocation5 + $0x630] sm:$0xff] }
 0x4e5   :  { %11592 = vmatmul.mubr.msk.f32.vlgmr.msra.gmra.mrb[72].mxu1 %vm80_vm1, %v12027_v41  ;;  %11593 = vmatmul.mubr.msk.f32.vlgmr.msra.gmra.mrb[74].mxu0 %vm80_vm1, %v12027_v41 }
 0x4e6   :  { %5733 = vmatpush1.msra.mxu1 %v781_v50  ;;  %5796 = vmatprep.mubr.f32.mxu1 %v11848_v1  ;;  %v846_v50 = vld [vmem:[#allocation5 + $0x648] sm:$0xff] }
 0x4e7   :  { %5804 = vmatpush1.msra.mxu0 %v783_v51  ;;  %5867 = vmatprep.mubr.f32.mxu0 %v11848_v1  ;;  %v848_v51 = vld [vmem:[#allocation5 + $0x658] sm:$0xff] }
 0x4e8   :  { %5874 = vmatprep.subr.mxu1 %v786_v52  ;;  %5945 = vmatprep.subr.mxu0 %v788_v53  ;;  %v845_v52 = vld [vmem:[#allocation5 + $0x640] sm:$0xff]  ;;  %v847_v53 = vld [vmem:[#allocation5 + $0x650] sm:$0xff] }
 0x4e9   :  { %11594 = vmatmul.mubr.msk.f32.vlgmr.msra.gmra.mrb[74].mxu1 %vm80_vm1, %v12027_v41  ;;  %11595 = vmatmul.mubr.msk.f32.vlgmr.msra.gmra.mrb[76].mxu0 %vm80_vm1, %v12027_v41 }
 0x4ea   :  { %5875 = vmatpush1.msra.mxu1 %v785_v54  ;;  %5938 = vmatprep.mubr.f32.mxu1 %v11848_v1  ;;  %v850_v54 = vld [vmem:[#allocation5 + $0x668] sm:$0xff] }
 0x4eb   :  { %5946 = vmatpush1.msra.mxu0 %v787_v55  ;;  %6009 = vmatprep.mubr.f32.mxu0 %v11848_v1  ;;  %v852_v55 = vld [vmem:[#allocation5 + $0x678] sm:$0xff] }
 0x4ec   :  { %6016 = vmatprep.subr.mxu1 %v790_v56  ;;  %6087 = vmatprep.subr.mxu0 %v792_v57  ;;  %v849_v56 = vld [vmem:[#allocation5 + $0x660] sm:$0xff]  ;;  %v851_v57 = vld [vmem:[#allocation5 + $0x670] sm:$0xff] }
 0x4ed   :  { %11596 = vmatmul.mubr.msk.f32.vlgmr.msra.gmra.mrb[76].mxu1 %vm80_vm1, %v12027_v41  ;;  %11597 = vmatmul.mubr.msk.f32.vlgmr.msra.gmra.mrb[78].mxu0 %vm80_vm1, %v12027_v41 }
 0x4ee   :  { %6017 = vmatpush1.msra.mxu1 %v789_v58  ;;  %6080 = vmatprep.mubr.f32.mxu1 %v11848_v1  ;;  %v854_v58 = vld [vmem:[#allocation5 + $0x688] sm:$0xff] }
 0x4ef   :  { %6088 = vmatpush1.msra.mxu0 %v791_v59  ;;  %6151 = vmatprep.mubr.f32.mxu0 %v11848_v1  ;;  %v856_v59 = vld [vmem:[#allocation5 + $0x698] sm:$0xff] }
 0x4f0   :  { %6158 = vmatprep.subr.mxu1 %v794_v60  ;;  %6229 = vmatprep.subr.mxu0 %v796_v61  ;;  %v853_v60 = vld [vmem:[#allocation5 + $0x680] sm:$0xff]  ;;  %v855_v61 = vld [vmem:[#allocation5 + $0x690] sm:$0xff] }
 0x4f1   :  { %11598 = vmatmul.mubr.msk.f32.vlgmr.msra.gmra.mrb[78].mxu1 %vm80_vm1, %v12027_v41  ;;  %11599 = vmatmul.mubr.msk.f32.vlgmr.msra.gmra.mrb[80].mxu0 %vm80_vm1, %v12027_v41 }
 0x4f2   :  { %6159 = vmatpush1.msra.mxu1 %v793_v62  ;;  %6222 = vmatprep.mubr.f32.mxu1 %v11848_v1  ;;  %v11849_v62 = vmov 1983009808  }
 0x4f3   :  { %6230 = vmatpush1.msra.mxu0 %v795_v63  ;;  %6293 = vmatprep.mubr.f32.mxu0 %v11848_v1  ;;  %v10251_v63 = vunpack.c.l.s4 %v11849_v62 }
 0x4f4   :  { %6300 = vmatprep.subr.mxu1 %v798_v0  ;;  %6371 = vmatprep.subr.mxu0 %v800_v2  ;;  %v10253_v0 = vlaneseq  ;;  %v858_v2 = vld [vmem:[#allocation5 + $0x6a8] sm:$0xff] }
 0x4f5   :  { %11600 = vmatmul.mubr.msk.f32.vlgmr.msra.gmra.mrb[80].mxu1 %vm80_vm1, %v12027_v41  ;;  %11601 = vmatmul.mubr.msk.f32.vlgmr.msra.gmra.mrb[82].mxu0 %vm80_vm1, %v12027_v41 }
 0x4f6   :  { %6301 = vmatpush1.msra.mxu1 %v797_v3  ;;  %6364 = vmatprep.mubr.f32.mxu1 %v11848_v1  ;;  %v860_v3 = vld [vmem:[#allocation5 + $0x6b8] sm:$0xff] }
 0x4f7   :  { %6372 = vmatpush1.msra.mxu0 %v799_v4  ;;  %6435 = vmatprep.mubr.f32.mxu0 %v11848_v1  ;;  %v857_v4 = vld [vmem:[#allocation5 + $0x6a0] sm:$0xff] }
 0x4f8   :  { %6442 = vmatprep.subr.mxu1 %v802_v5  ;;  %6513 = vmatprep.subr.mxu0 %v804_v6  ;;  %v859_v5 = vld [vmem:[#allocation5 + $0x6b0] sm:$0xff]  ;;  %v10252_v6 = vunpack.c.0.s8 %v10251_v63 }
 0x4f9   :  { %11602 = vmatmul.mubr.msk.f32.vlgmr.msra.gmra.mrb[82].mxu1 %vm80_vm1, %v12027_v41  ;;  %11603 = vmatmul.mubr.msk.f32.vlgmr.msra.gmra.mrb[84].mxu0 %vm80_vm1, %v12027_v41 }
 0x4fa   :  { %6443 = vmatpush1.msra.mxu1 %v801_v7  ;;  %6506 = vmatprep.mubr.f32.mxu1 %v11848_v1  ;;  %v10254_v7 = vshrl.u32 %v10253_v0, 7 }
 0x4fb   :  { %6514 = vmatpush1.msra.mxu0 %v803_v8  ;;  %6577 = vmatprep.mubr.f32.mxu0 %v11848_v1  ;;  %v862_v8 = vld [vmem:[#allocation5 + $0x6c8] sm:$0xff] }
 0x4fc   :  { %6584 = vmatprep.subr.mxu1 %v806_v9  ;;  %6655 = vmatprep.subr.mxu0 %v808_v10  ;;  %v864_v9 = vld [vmem:[#allocation5 + $0x6d8] sm:$0xff]  ;;  %v861_v10 = vld [vmem:[#allocation5 + $0x6c0] sm:$0xff] }
 0x4fd   :  { %11604 = vmatmul.mubr.msk.f32.vlgmr.msra.gmra.mrb[84].mxu1 %vm80_vm1, %v12027_v41  ;;  %11605 = vmatmul.mubr.msk.f32.vlgmr.msra.gmra.mrb[86].mxu0 %vm80_vm1, %v12027_v41 }
 0x4fe   :  { %6585 = vmatpush1.msra.mxu1 %v805_v11  ;;  %6648 = vmatprep.mubr.f32.mxu1 %v11848_v1 }
 0x4ff   :  { %6656 = vmatpush1.msra.mxu0 %v807_v12  ;;  %6719 = vmatprep.mubr.f32.mxu0 %v11848_v1 }
 0x500   :  { %6726 = vmatprep.subr.mxu1 %v810_v13  ;;  %6797 = vmatprep.subr.mxu0 %v812_v14  ;;  %v12347_v13 = vsub.s32 %v10252_v6, %v10254_v7  ;;  %v863_v14 = vld [vmem:[#allocation5 + $0x6d0] sm:$0xff]  ;;  %v882_v6 = vld [vmem:[#allocation5 + $0x768] sm:$0xff]  ;;  %v884_v7 = vld [vmem:[#allocation5 + $0x778] sm:$0xff] }
 0x501   :  { %11606 = vmatmul.mubr.msk.f32.vlgmr.msra.gmra.mrb[86].mxu1 %vm80_vm1, %v12027_v41  ;;  %11607 = vmatmul.mubr.msk.f32.vlgmr.msra.gmra.mrb[88].mxu0 %vm80_vm1, %v12027_v41 }
 0x502   :  { %6727 = vmatpush1.msra.mxu1 %v809_v15  ;;  %6790 = vmatprep.mubr.f32.mxu1 %v11848_v1 }
 0x503   :  { %6798 = vmatpush1.msra.mxu0 %v811_v16  ;;  %6861 = vmatprep.mubr.f32.mxu0 %v11848_v1 }
 0x504   :  { %6868 = vmatprep.subr.mxu1 %v814_v17  ;;  %6939 = vmatprep.subr.mxu0 %v816_v18  ;;  %v866_v17 = vld [vmem:[#allocation5 + $0x6e8] sm:$0xff]  ;;  %v868_v18 = vld [vmem:[#allocation5 + $0x6f8] sm:$0xff] }
 0x505   :  { %11608 = vmatmul.mubr.msk.f32.vlgmr.msra.gmra.mrb[88].mxu1 %vm80_vm1, %v12027_v41  ;;  %11609 = vmatmul.mubr.msk.f32.vlgmr.msra.gmra.mrb[90].mxu0 %vm80_vm1, %v12027_v41 }
 0x506   :  { %6869 = vmatpush1.msra.mxu1 %v813_v19  ;;  %6932 = vmatprep.mubr.f32.mxu1 %v11848_v1 }
 0x507   :  { %6940 = vmatpush1.msra.mxu0 %v815_v20  ;;  %7003 = vmatprep.mubr.f32.mxu0 %v11848_v1 }
 0x508   :  { %7010 = vmatprep.subr.mxu1 %v818_v21  ;;  %7081 = vmatprep.subr.mxu0 %v820_v22  ;;  %v865_v21 = vld [vmem:[#allocation5 + $0x6e0] sm:$0xff] }
 0x509   :  { %11610 = vmatmul.mubr.msk.f32.vlgmr.msra.gmra.mrb[90].mxu1 %vm80_vm1, %v12027_v41  ;;  %11611 = vmatmul.mubr.msk.f32.vlgmr.msra.gmra.mrb[92].mxu0 %vm80_vm1, %v12027_v41 }
 0x50a   :  { %7011 = vmatpush1.msra.mxu1 %v817_v23  ;;  %7074 = vmatprep.mubr.f32.mxu1 %v11848_v1 }
 0x50b   :  { %7082 = vmatpush1.msra.mxu0 %v819_v24  ;;  %7145 = vmatprep.mubr.f32.mxu0 %v11848_v1 }
 0x50c   :  { %7152 = vmatprep.subr.mxu1 %v822_v25  ;;  %7223 = vmatprep.subr.mxu0 %v824_v26  ;;  %v867_v26 = vld [vmem:[#allocation5 + $0x6f0] sm:$0xff] }
 0x50d   :  { %11612 = vmatmul.mubr.msk.f32.vlgmr.msra.gmra.mrb[92].mxu1 %vm80_vm1, %v12027_v41  ;;  %11613 = vmatmul.mubr.msk.f32.vlgmr.msra.gmra.mrb[94].mxu0 %vm80_vm1, %v12027_v41 }
 0x50e   :  { %7153 = vmatpush1.msra.mxu1 %v821_v27  ;;  %7216 = vmatprep.mubr.f32.mxu1 %v11848_v1 }
 0x50f   :  { %7224 = vmatpush1.msra.mxu0 %v823_v28  ;;  %7287 = vmatprep.mubr.f32.mxu0 %v11848_v1 }
 0x510   :  { %7294 = vmatprep.subr.mxu1 %v826_v29  ;;  %7365 = vmatprep.subr.mxu0 %v828_v30  ;;  %v870_v29 = vld [vmem:[#allocation5 + $0x708] sm:$0xff]  ;;  %v872_v30 = vld [vmem:[#allocation5 + $0x718] sm:$0xff] }
 0x511   :  { %11614 = vmatmul.mubr.msk.f32.vlgmr.msra.gmra.mrb[94].mxu1 %vm80_vm1, %v12027_v41  ;;  %11615 = vmatmul.mubr.msk.f32.vlgmr.msra.gmra.mrb[96].mxu0 %vm80_vm1, %v12027_v41 }
 0x512   :  { %7295 = vmatpush1.msra.mxu1 %v825_v31  ;;  %7358 = vmatprep.mubr.f32.mxu1 %v11848_v1 }
 0x513   :  { %7366 = vmatpush1.msra.mxu0 %v827_v32  ;;  %7429 = vmatprep.mubr.f32.mxu0 %v11848_v1 }
 0x514   :  { %7436 = vmatprep.subr.mxu1 %v830_v33  ;;  %7507 = vmatprep.subr.mxu0 %v832_v34  ;;  %v869_v34 = vld [vmem:[#allocation5 + $0x700] sm:$0xff] }
 0x515   :  { %11616 = vmatmul.mubr.msk.f32.vlgmr.msra.gmra.mrb[96].mxu1 %vm80_vm1, %v12027_v41  ;;  %11617 = vmatmul.mubr.msk.f32.vlgmr.msra.gmra.mrb[98].mxu0 %vm80_vm1, %v12027_v41 }
 0x516   :  { %7437 = vmatpush1.msra.mxu1 %v829_v35  ;;  %7500 = vmatprep.mubr.f32.mxu1 %v11848_v1 }
 0x517   :  { %7508 = vmatpush1.msra.mxu0 %v831_v36  ;;  %7571 = vmatprep.mubr.f32.mxu0 %v11848_v1 }
 0x518   :  { %7578 = vmatprep.subr.mxu1 %v834_v37  ;;  %7649 = vmatprep.subr.mxu0 %v836_v38 }
 0x519   :  { %11618 = vmatmul.mubr.msk.f32.vlgmr.msra.gmra.mrb[98].mxu1 %vm80_vm1, %v12027_v41  ;;  %11619 = vmatmul.mubr.msk.f32.vlgmr.msra.gmra.mrb[100].mxu0 %vm80_vm1, %v12027_v41 }
 0x51a   :  { %7579 = vmatpush1.msra.mxu1 %v833_v39  ;;  %7642 = vmatprep.mubr.f32.mxu1 %v11848_v1  ;;  %v871_v39 = vld [vmem:[#allocation5 + $0x710] sm:$0xff] }
 0x51b   :  { %7650 = vmatpush1.msra.mxu0 %v835_v40  ;;  %7713 = vmatprep.mubr.f32.mxu0 %v11848_v1 }
 0x51c   :  { %7720 = vmatprep.subr.mxu1 %v838_v42  ;;  %7791 = vmatprep.subr.mxu0 %v840_v43  ;;  %v874_v43 = vld [vmem:[#allocation5 + $0x728] sm:$0xff] }
 0x51d   :  { %11620 = vmatmul.mubr.msk.f32.vlgmr.msra.gmra.mrb[100].mxu1 %vm80_vm1, %v12027_v41  ;;  %11621 = vmatmul.mubr.msk.f32.vlgmr.msra.gmra.mrb[102].mxu0 %vm80_vm1, %v12027_v41 }
 0x51e   :  { %7721 = vmatpush1.msra.mxu1 %v837_v44  ;;  %7784 = vmatprep.mubr.f32.mxu1 %v11848_v1  ;;  %v876_v44 = vld [vmem:[#allocation5 + $0x738] sm:$0xff] }
 0x51f   :  { %7792 = vmatpush1.msra.mxu0 %v839_v45  ;;  %7855 = vmatprep.mubr.f32.mxu0 %v11848_v1 }
 0x520   :  { %7862 = vmatprep.subr.mxu1 %v842_v46  ;;  %7933 = vmatprep.subr.mxu0 %v844_v47 }
 0x521   :  { %11622 = vmatmul.mubr.msk.f32.vlgmr.msra.gmra.mrb[102].mxu1 %vm80_vm1, %v12027_v41  ;;  %11623 = vmatmul.mubr.msk.f32.vlgmr.msra.gmra.mrb[104].mxu0 %vm80_vm1, %v12027_v41 }
 0x522   :  { %7863 = vmatpush1.msra.mxu1 %v841_v48  ;;  %7926 = vmatprep.mubr.f32.mxu1 %v11848_v1  ;;  %v873_v48 = vld [vmem:[#allocation5 + $0x720] sm:$0xff] }
 0x523   :  { %7934 = vmatpush1.msra.mxu0 %v843_v49  ;;  %7997 = vmatprep.mubr.f32.mxu0 %v11848_v1 }
 0x524   :  { %8004 = vmatprep.subr.mxu1 %v846_v50  ;;  %8075 = vmatprep.subr.mxu0 %v848_v51 }
 0x525   :  { %11624 = vmatmul.mubr.msk.f32.vlgmr.msra.gmra.mrb[104].mxu1 %vm80_vm1, %v12027_v41  ;;  %11625 = vmatmul.mubr.msk.f32.vlgmr.msra.gmra.mrb[106].mxu0 %vm80_vm1, %v12027_v41 }
 0x526   :  { %8005 = vmatpush1.msra.mxu1 %v845_v52  ;;  %8068 = vmatprep.mubr.f32.mxu1 %v11848_v1 }
 0x527   :  { %8076 = vmatpush1.msra.mxu0 %v847_v53  ;;  %8139 = vmatprep.mubr.f32.mxu0 %v11848_v1  ;;  %v875_v53 = vld [vmem:[#allocation5 + $0x730] sm:$0xff] }
 0x528   :  { %8146 = vmatprep.subr.mxu1 %v850_v54  ;;  %8217 = vmatprep.subr.mxu0 %v852_v55 }
 0x529   :  { %11626 = vmatmul.mubr.msk.f32.vlgmr.msra.gmra.mrb[106].mxu1 %vm80_vm1, %v12027_v41  ;;  %11627 = vmatmul.mubr.msk.f32.vlgmr.msra.gmra.mrb[108].mxu0 %vm80_vm1, %v12027_v41 }
 0x52a   :  { %8147 = vmatpush1.msra.mxu1 %v849_v56  ;;  %8210 = vmatprep.mubr.f32.mxu1 %v11848_v1  ;;  %v878_v56 = vld [vmem:[#allocation5 + $0x748] sm:$0xff] }
 0x52b   :  { %8218 = vmatpush1.msra.mxu0 %v851_v57  ;;  %8281 = vmatprep.mubr.f32.mxu0 %v11848_v1  ;;  %v880_v57 = vld [vmem:[#allocation5 + $0x758] sm:$0xff] }
 0x52c   :  { %8288 = vmatprep.subr.mxu1 %v854_v58  ;;  %8359 = vmatprep.subr.mxu0 %v856_v59 }
 0x52d   :  { %11628 = vmatmul.mubr.msk.f32.vlgmr.msra.gmra.mrb[108].mxu1 %vm80_vm1, %v12027_v41  ;;  %11629 = vmatmul.mubr.msk.f32.vlgmr.msra.gmra.mrb[110].mxu0 %vm80_vm1, %v12027_v41 }
 0x52e   :  { %8289 = vmatpush1.msra.mxu1 %v853_v60  ;;  %8352 = vmatprep.mubr.f32.mxu1 %v11848_v1 }
 0x52f   :  { %8360 = vmatpush1.msra.mxu0 %v855_v61  ;;  %8423 = vmatprep.mubr.f32.mxu0 %v11848_v1  ;;  %v877_v61 = vld [vmem:[#allocation5 + $0x740] sm:$0xff] }
 0x530   :  { %8430 = vmatprep.subr.mxu1 %v858_v2  ;;  %8501 = vmatprep.subr.mxu0 %v860_v3  ;;  %v879_v3 = vld [vmem:[#allocation5 + $0x750] sm:$0xff] }
 0x531   :  { %11630 = vmatmul.mubr.msk.f32.vlgmr.msra.gmra.mrb[110].mxu1 %vm80_vm1, %v12027_v41  ;;  %11631 = vmatmul.mubr.msk.f32.vlgmr.msra.gmra.mrb[112].mxu0 %vm80_vm1, %v12027_v41 }
 0x532   :  { %8431 = vmatpush1.msra.mxu1 %v857_v4  ;;  %8494 = vmatprep.mubr.f32.mxu1 %v11848_v1 }
 0x533   :  { %8502 = vmatpush1.msra.mxu0 %v859_v5  ;;  %8565 = vmatprep.mubr.f32.mxu0 %v11848_v1 }
 0x534   :  { %v970_v11 = vpop.f32.mrb[6].mxu1  ;;  %v1041_v12 = vpop.f32.mrb[8].mxu0  ;;  %8572 = vmatprep.subr.mxu1 %v862_v8  ;;  %8643 = vmatprep.subr.mxu0 %v864_v9 }
 0x535   :  { %11632 = vmatmul.mubr.msk.f32.vlgmr.msra.gmra.mrb[112].mxu1 %vm80_vm1, %v12027_v41  ;;  %11633 = vmatmul.mubr.msk.f32.vlgmr.msra.gmra.mrb[114].mxu0 %vm80_vm1, %v12027_v41  ;;  %v972_v15 = vpop.f32.mrb[7].mxu1  ;;  %v1043_v16 = vpop.f32.mrb[9].mxu0 }
 0x536   :  { %v10248_v19 = vcombine.low %v970_v11, %v972_v15  ;;  %v10249_v20 = vcombine.low %v1041_v12, %v1043_v16  ;;  %8573 = vmatpush1.msra.mxu1 %v861_v10  ;;  %8636 = vmatprep.mubr.f32.mxu1 %v11848_v1  ;;  %v881_v11 = vld [vmem:[#allocation5 + $0x760] sm:$0xff] }
 0x537   :  { %8644 = vmatpush1.msra.mxu0 %v863_v14  ;;  %8707 = vmatprep.mubr.f32.mxu0 %v11848_v1 }
 0x538   :  { %v10256_v22 = vrot.slane %v10248_v19, %v12347_v13  ;;  %v10263_v23 = vrot.slane %v10249_v20, %v12347_v13  ;;  %v1112_v24 = vpop.f32.mrb[8].mxu1  ;;  %v1183_v25 = vpop.f32.mrb[10].mxu0  ;;  %8714 = vmatprep.subr.mxu1 %v866_v17  ;;  %8785 = vmatprep.subr.mxu0 %v868_v18  ;;  %v883_v17 = vld [vmem:[#allocation5 + $0x770] sm:$0xff]  ;;  %v886_v20 = vld [vmem:[#allocation5 + $0x788] sm:$0xff] }
 0x539   :  { %v1114_v27 = vpop.f32.mrb[9].mxu1  ;;  %v1185_v28 = vpop.f32.mrb[11].mxu0  ;;  %11634 = vmatmul.mubr.msk.f32.vlgmr.msra.gmra.mrb[114].mxu1 %vm80_vm1, %v12027_v41  ;;  %11635 = vmatmul.mubr.msk.f32.vlgmr.msra.gmra.mrb[116].mxu0 %vm80_vm1, %v12027_v41 }
 0x53a   :  { %v10264_v31 = vcombine.low %v10256_v22, %v10263_v23  ;;  %v10265_v32 = vcombine.low %v1112_v24, %v1114_v27  ;;  %v10266_v33 = vcombine.low %v1183_v25, %v1185_v28  ;;  %8715 = vmatpush1.msra.mxu1 %v865_v21  ;;  %8778 = vmatprep.mubr.f32.mxu1 %v11848_v1  ;;  %v888_v21 = vld [vmem:[#allocation5 + $0x798] sm:$0xff]  ;;  %v885_v25 = vld [vmem:[#allocation5 + $0x780] sm:$0xff] }
 0x53b   :  { %8786 = vmatpush1.msra.mxu0 %v867_v26  ;;  %8849 = vmatprep.mubr.f32.mxu0 %v11848_v1 }
 0x53c   :  { %11400 = vst [vmem:[#allocation10] sm:$0xff] %v10264_v31  ;;  %v10273_v35 = vrot.slane %v10265_v32, %v12347_v13  ;;  %v10280_v36 = vrot.slane %v10266_v33, %v12347_v13  ;;  %v1254_v37 = vpop.f32.mrb[10].mxu1  ;;  %v1325_v38 = vpop.f32.mrb[12].mxu0  ;;  %8856 = vmatprep.subr.mxu1 %v870_v29  ;;  %8927 = vmatprep.subr.mxu0 %v872_v30  ;;  %v887_v30 = vld [vmem:[#allocation5 + $0x790] sm:$0xff]  ;;  %v890_v33 = vld [vmem:[#allocation5 + $0x7a8] sm:$0xff] }
 0x53d   :  { %v1256_v40 = vpop.f32.mrb[11].mxu1  ;;  %v1327_v42 = vpop.f32.mrb[13].mxu0  ;;  %11636 = vmatmul.mubr.msk.f32.vlgmr.msra.gmra.mrb[116].mxu1 %vm80_vm1, %v12027_v41  ;;  %11637 = vmatmul.mubr.msk.f32.vlgmr.msra.gmra.mrb[118].mxu0 %vm80_vm1, %v12027_v41 }
 0x53e   :  { %v10281_v45 = vcombine.low %v10273_v35, %v10280_v36  ;;  %v10282_v46 = vcombine.low %v1254_v37, %v1256_v40  ;;  %v10283_v47 = vcombine.low %v1325_v38, %v1327_v42  ;;  %8857 = vmatpush1.msra.mxu1 %v869_v34  ;;  %8920 = vmatprep.mubr.f32.mxu1 %v11848_v1  ;;  %v892_v34 = vld [vmem:[#allocation5 + $0x7b8] sm:$0xff]  ;;  %v889_v38 = vld [vmem:[#allocation5 + $0x7a0] sm:$0xff] }
 0x53f   :  { %8928 = vmatpush1.msra.mxu0 %v871_v39  ;;  %8991 = vmatprep.mubr.f32.mxu0 %v11848_v1 }
 0x540   :  { %11401 = vst [vmem:[#allocation10 + $0x8] sm:$0xff] %v10281_v45  ;;  %v10290_v49 = vrot.slane %v10282_v46, %v12347_v13  ;;  %v10297_v50 = vrot.slane %v10283_v47, %v12347_v13  ;;  %v1396_v51 = vpop.f32.mrb[12].mxu1  ;;  %v1467_v52 = vpop.f32.mrb[14].mxu0  ;;  %8998 = vmatprep.subr.mxu1 %v874_v43  ;;  %9069 = vmatprep.subr.mxu0 %v876_v44  ;;  %v891_v44 = vld [vmem:[#allocation5 + $0x7b0] sm:$0xff]  ;;  %v894_v47 = vld [vmem:[#allocation5 + $0x7c8] sm:$0xff] }
 0x541   :  { %v1398_v54 = vpop.f32.mrb[13].mxu1  ;;  %v1469_v55 = vpop.f32.mrb[15].mxu0  ;;  %11638 = vmatmul.mubr.msk.f32.vlgmr.msra.gmra.mrb[118].mxu1 %vm80_vm1, %v12027_v41  ;;  %11639 = vmatmul.mubr.msk.f32.vlgmr.msra.gmra.mrb[120].mxu0 %vm80_vm1, %v12027_v41 }
 0x542   :  { %v10298_v58 = vcombine.low %v10290_v49, %v10297_v50  ;;  %v10299_v59 = vcombine.low %v1396_v51, %v1398_v54  ;;  %v10300_v60 = vcombine.low %v1467_v52, %v1469_v55  ;;  %8999 = vmatpush1.msra.mxu1 %v873_v48  ;;  %9062 = vmatprep.mubr.f32.mxu1 %v11848_v1  ;;  %v896_v48 = vld [vmem:[#allocation5 + $0x7d8] sm:$0xff]  ;;  %v893_v52 = vld [vmem:[#allocation5 + $0x7c0] sm:$0xff] }
 0x543   :  { %9070 = vmatpush1.msra.mxu0 %v875_v53  ;;  %9133 = vmatprep.mubr.f32.mxu0 %v11848_v1 }
 0x544   :  { %11402 = vst [vmem:[#allocation10 + $0x10] sm:$0xff] %v10298_v58  ;;  %v10307_v62 = vrot.slane %v10299_v59, %v12347_v13  ;;  %v10314_v63 = vrot.slane %v10300_v60, %v12347_v13  ;;  %v1538_v0 = vpop.f32.mrb[14].mxu1  ;;  %v1609_v2 = vpop.f32.mrb[16].mxu0  ;;  %9140 = vmatprep.subr.mxu1 %v878_v56  ;;  %9211 = vmatprep.subr.mxu0 %v880_v57  ;;  %v895_v57 = vld [vmem:[#allocation5 + $0x7d0] sm:$0xff]  ;;  %v898_v60 = vld [vmem:[#allocation5 + $0x7e8] sm:$0xff] }
 0x545   :  { %v1540_v4 = vpop.f32.mrb[15].mxu1  ;;  %v1611_v5 = vpop.f32.mrb[17].mxu0  ;;  %11640 = vmatmul.mubr.msk.f32.vlgmr.msra.gmra.mrb[120].mxu1 %vm80_vm1, %v12027_v41  ;;  %11641 = vmatmul.mubr.msk.f32.vlgmr.msra.gmra.mrb[122].mxu0 %vm80_vm1, %v12027_v41 }
 0x546   :  { %v10315_v8 = vcombine.low %v10307_v62, %v10314_v63  ;;  %v10316_v9 = vcombine.low %v1538_v0, %v1540_v4  ;;  %v10317_v10 = vcombine.low %v1609_v2, %v1611_v5  ;;  %9141 = vmatpush1.msra.mxu1 %v877_v61  ;;  %9204 = vmatprep.mubr.f32.mxu1 %v11848_v1  ;;  %v900_v61 = vld [vmem:[#allocation5 + $0x7f8] sm:$0xff]  ;;  %v897_v2 = vld [vmem:[#allocation5 + $0x7e0] sm:$0xff] }
 0x547   :  { %9212 = vmatpush1.msra.mxu0 %v879_v3  ;;  %9275 = vmatprep.mubr.f32.mxu0 %v11848_v1 }
 0x548   :  { %11403 = vst [vmem:[#allocation10 + $0x18] sm:$0xff] %v10315_v8  ;;  %v10324_v12 = vrot.slane %v10316_v9, %v12347_v13  ;;  %v10331_v14 = vrot.slane %v10317_v10, %v12347_v13  ;;  %v1680_v15 = vpop.f32.mrb[16].mxu1  ;;  %v1751_v16 = vpop.f32.mrb[18].mxu0  ;;  %9282 = vmatprep.subr.mxu1 %v882_v6  ;;  %9353 = vmatprep.subr.mxu0 %v884_v7  ;;  %v899_v7 = vld [vmem:[#allocation5 + $0x7f0] sm:$0xff] }
 0x549   :  { %v1682_v18 = vpop.f32.mrb[17].mxu1  ;;  %v1753_v19 = vpop.f32.mrb[19].mxu0  ;;  %11642 = vmatmul.mubr.msk.f32.vlgmr.msra.gmra.mrb[122].mxu1 %vm80_vm1, %v12027_v41  ;;  %11643 = vmatmul.mubr.msk.f32.vlgmr.msra.gmra.mrb[124].mxu0 %vm80_vm1, %v12027_v41 }
 0x54a   :  { %v10332_v22 = vcombine.low %v10324_v12, %v10331_v14  ;;  %v10333_v23 = vcombine.low %v1680_v15, %v1682_v18  ;;  %v10334_v24 = vcombine.low %v1751_v16, %v1753_v19  ;;  %9283 = vmatpush1.msra.mxu1 %v881_v11  ;;  %9346 = vmatprep.mubr.f32.mxu1 %v11848_v1 }
 0x54b   :  { %9354 = vmatpush1.msra.mxu0 %v883_v17  ;;  %9417 = vmatprep.mubr.f32.mxu0 %v11848_v1 }
 0x54c   :  { %11404 = vst [vmem:[#allocation10 + $0x20] sm:$0xff] %v10332_v22  ;;  %v10341_v26 = vrot.slane %v10333_v23, %v12347_v13  ;;  %v10348_v27 = vrot.slane %v10334_v24, %v12347_v13  ;;  %v1822_v28 = vpop.f32.mrb[18].mxu1  ;;  %v1893_v29 = vpop.f32.mrb[20].mxu0  ;;  %9424 = vmatprep.subr.mxu1 %v886_v20  ;;  %9495 = vmatprep.subr.mxu0 %v888_v21 }
 0x54d   :  { %v1824_v31 = vpop.f32.mrb[19].mxu1  ;;  %v1895_v32 = vpop.f32.mrb[21].mxu0  ;;  %11644 = vmatmul.mubr.msk.f32.vlgmr.msra.gmra.mrb[124].mxu1 %vm80_vm1, %v12027_v41  ;;  %11645 = vmatmul.mubr.msk.f32.vlgmr.msra.gmra.mrb[126].mxu0 %vm80_vm1, %v12027_v41 }
 0x54e   :  { %v10349_v35 = vcombine.low %v10341_v26, %v10348_v27  ;;  %v10350_v36 = vcombine.low %v1822_v28, %v1824_v31  ;;  %v10351_v37 = vcombine.low %v1893_v29, %v1895_v32  ;;  %9425 = vmatpush1.msra.mxu1 %v885_v25  ;;  %9488 = vmatprep.mubr.f32.mxu1 %v11848_v1 }
 0x54f   :  { %9496 = vmatpush1.msra.mxu0 %v887_v30  ;;  %9559 = vmatprep.mubr.f32.mxu0 %v11848_v1 }
 0x550   :  { %11405 = vst [vmem:[#allocation10 + $0x28] sm:$0xff] %v10349_v35  ;;  %v10358_v39 = vrot.slane %v10350_v36, %v12347_v13  ;;  %v10365_v40 = vrot.slane %v10351_v37, %v12347_v13  ;;  %v1964_v42 = vpop.f32.mrb[20].mxu1  ;;  %v2035_v43 = vpop.f32.mrb[22].mxu0  ;;  %9566 = vmatprep.subr.mxu1 %v890_v33  ;;  %9637 = vmatprep.subr.mxu0 %v892_v34 }
 0x551   :  { %v1966_v45 = vpop.f32.mrb[21].mxu1  ;;  %v2037_v46 = vpop.f32.mrb[23].mxu0  ;;  %11646 = vmatmul.mubr.msk.f32.vlgmr.msra.gmra.mrb[126].mxu1 %vm80_vm1, %v12027_v41  ;;  %11647 = vmatmul.mubr.msk.f32.vlgmr.msra.gmra.mrb[128].mxu0 %vm80_vm1, %v12027_v41 }
 0x552   :  { %v10366_v49 = vcombine.low %v10358_v39, %v10365_v40  ;;  %v10367_v50 = vcombine.low %v1964_v42, %v1966_v45  ;;  %v10368_v51 = vcombine.low %v2035_v43, %v2037_v46  ;;  %9567 = vmatpush1.msra.mxu1 %v889_v38  ;;  %9630 = vmatprep.mubr.f32.mxu1 %v11848_v1 }
 0x553   :  { %9638 = vmatpush1.msra.mxu0 %v891_v44  ;;  %9701 = vmatprep.mubr.f32.mxu0 %v11848_v1 }
 0x554   :  { %11406 = vst [vmem:[#allocation10 + $0x30] sm:$0xff] %v10366_v49  ;;  %v10375_v53 = vrot.slane %v10367_v50, %v12347_v13  ;;  %v10382_v54 = vrot.slane %v10368_v51, %v12347_v13  ;;  %v2106_v55 = vpop.f32.mrb[22].mxu1  ;;  %v2177_v56 = vpop.f32.mrb[24].mxu0  ;;  %9708 = vmatprep.subr.mxu1 %v894_v47  ;;  %9779 = vmatprep.subr.mxu0 %v896_v48 }
 0x555   :  { %v2108_v58 = vpop.f32.mrb[23].mxu1  ;;  %v2179_v59 = vpop.f32.mrb[25].mxu0  ;;  %11648 = vmatmul.mubr.msk.f32.vlgmr.msra.gmra.mrb[128].mxu1 %vm80_vm1, %v12027_v41  ;;  %11649 = vmatmul.mubr.msk.f32.vlgmr.msra.gmra.mrb[130].mxu0 %vm80_vm1, %v12027_v41 }
 0x556   :  { %v10383_v62 = vcombine.low %v10375_v53, %v10382_v54  ;;  %v10384_v63 = vcombine.low %v2106_v55, %v2108_v58  ;;  %v10385_v0 = vcombine.low %v2177_v56, %v2179_v59  ;;  %9709 = vmatpush1.msra.mxu1 %v893_v52  ;;  %9772 = vmatprep.mubr.f32.mxu1 %v11848_v1 }
 0x557   :  { %9780 = vmatpush1.msra.mxu0 %v895_v57  ;;  %9843 = vmatprep.mubr.f32.mxu0 %v11848_v1 }
 0x558   :  { %11407 = vst [vmem:[#allocation10 + $0x38] sm:$0xff] %v10383_v62  ;;  %v10392_v3 = vrot.slane %v10384_v63, %v12347_v13  ;;  %v10399_v4 = vrot.slane %v10385_v0, %v12347_v13  ;;  %v2248_v5 = vpop.f32.mrb[24].mxu1  ;;  %v2319_v6 = vpop.f32.mrb[26].mxu0  ;;  %9850 = vmatprep.subr.mxu1 %v898_v60  ;;  %9921 = vmatprep.subr.mxu0 %v900_v61 }
 0x559   :  { %v2250_v8 = vpop.f32.mrb[25].mxu1  ;;  %v2321_v9 = vpop.f32.mrb[27].mxu0  ;;  %11650 = vmatmul.mubr.msk.f32.vlgmr.msra.gmra.mrb[130].mxu1 %vm80_vm1, %v12027_v41  ;;  %11651 = vmatmul.mubr.msk.f32.vlgmr.msra.gmra.mrb[132].mxu0 %vm80_vm1, %v12027_v41 }
 0x55a   :  { %v10400_v10 = vcombine.low %v10392_v3, %v10399_v4  ;;  %v10401_v11 = vcombine.low %v2248_v5, %v2250_v8  ;;  %v10402_v12 = vcombine.low %v2319_v6, %v2321_v9  ;;  %9851 = vmatpush1.msra.mxu1 %v897_v2  ;;  %9914 = vmatprep.mubr.f32.mxu1 %v11848_v1 }
 0x55b   :  { %9922 = vmatpush1.msra.mxu0 %v899_v7  ;;  %9985 = vmatprep.mubr.f32.mxu0 %v11848_v1 }
 0x55c   :  { %11408 = vst [vmem:[#allocation10 + $0x40] sm:$0xff] %v10400_v10  ;;  %v10409_v14 = vrot.slane %v10401_v11, %v12347_v13  ;;  %v10416_v15 = vrot.slane %v10402_v12, %v12347_v13  ;;  %v2390_v16 = vpop.f32.mrb[26].mxu1  ;;  %v2461_v17 = vpop.f32.mrb[28].mxu0 }
 0x55d   :  { %v2392_v18 = vpop.f32.mrb[27].mxu1  ;;  %v2463_v19 = vpop.f32.mrb[29].mxu0  ;;  %11652 = vmatmul.mubr.msk.f32.vlgmr.msra.gmra.mrb[132].mxu1 %vm80_vm1, %v12027_v41  ;;  %11653 = vmatmul.mubr.msk.f32.vlgmr.msra.gmra.mrb[134].mxu0 %vm80_vm1, %v12027_v41 }
 0x55e   :  { %v10417_v20 = vcombine.low %v10409_v14, %v10416_v15  ;;  %v10418_v21 = vcombine.low %v2390_v16, %v2392_v18  ;;  %v10419_v22 = vcombine.low %v2461_v17, %v2463_v19 }
 0x560   :  { %11409 = vst [vmem:[#allocation10 + $0x48] sm:$0xff] %v10417_v20  ;;  %v10426_v1 = vrot.slane %v10418_v21, %v12347_v13  ;;  %v10433_v23 = vrot.slane %v10419_v22, %v12347_v13  ;;  %v2532_v24 = vpop.f32.mrb[28].mxu1  ;;  %v2603_v25 = vpop.f32.mrb[30].mxu0 }
 0x561   :  { %v2534_v26 = vpop.f32.mrb[29].mxu1  ;;  %v2605_v27 = vpop.f32.mrb[31].mxu0 }
 0x562   :  { %v10434_v28 = vcombine.low %v10426_v1, %v10433_v23  ;;  %v10435_v29 = vcombine.low %v2532_v24, %v2534_v26  ;;  %v10436_v30 = vcombine.low %v2603_v25, %v2605_v27 }
 0x564   :  { %11410 = vst [vmem:[#allocation10 + $0x50] sm:$0xff] %v10434_v28  ;;  %v10443_v31 = vrot.slane %v10435_v29, %v12347_v13  ;;  %v10450_v41 = vrot.slane %v10436_v30, %v12347_v13  ;;  %v2674_v32 = vpop.f32.mrb[30].mxu1  ;;  %v2745_v33 = vpop.f32.mrb[32].mxu0 }
 0x565   :  { %v2676_v34 = vpop.f32.mrb[31].mxu1  ;;  %v2747_v35 = vpop.f32.mrb[33].mxu0 }
 0x566   :  { %v10451_v36 = vcombine.low %v10443_v31, %v10450_v41  ;;  %v10452_v37 = vcombine.low %v2674_v32, %v2676_v34  ;;  %v10453_v38 = vcombine.low %v2745_v33, %v2747_v35 }
 0x568   :  { %11411 = vst [vmem:[#allocation10 + $0x58] sm:$0xff] %v10451_v36  ;;  %v10460_v39 = vrot.slane %v10452_v37, %v12347_v13  ;;  %v10467_v40 = vrot.slane %v10453_v38, %v12347_v13  ;;  %v2816_v42 = vpop.f32.mrb[32].mxu1  ;;  %v2887_v43 = vpop.f32.mrb[34].mxu0 }
 0x569   :  { %v2818_v44 = vpop.f32.mrb[33].mxu1  ;;  %v2889_v45 = vpop.f32.mrb[35].mxu0 }
 0x56a   :  { %v10468_v46 = vcombine.low %v10460_v39, %v10467_v40  ;;  %v10469_v47 = vcombine.low %v2816_v42, %v2818_v44  ;;  %v10470_v48 = vcombine.low %v2887_v43, %v2889_v45 }
 0x56c   :  { %11412 = vst [vmem:[#allocation10 + $0x60] sm:$0xff] %v10468_v46  ;;  %v10477_v49 = vrot.slane %v10469_v47, %v12347_v13  ;;  %v10484_v50 = vrot.slane %v10470_v48, %v12347_v13  ;;  %v2958_v51 = vpop.f32.mrb[34].mxu1  ;;  %v3029_v52 = vpop.f32.mrb[36].mxu0 }
 0x56d   :  { %v2960_v53 = vpop.f32.mrb[35].mxu1  ;;  %v3031_v54 = vpop.f32.mrb[37].mxu0 }
 0x56e   :  { %v10485_v55 = vcombine.low %v10477_v49, %v10484_v50  ;;  %v10486_v56 = vcombine.low %v2958_v51, %v2960_v53  ;;  %v10487_v57 = vcombine.low %v3029_v52, %v3031_v54 }
 0x570   :  { %11413 = vst [vmem:[#allocation10 + $0x68] sm:$0xff] %v10485_v55  ;;  %v10494_v58 = vrot.slane %v10486_v56, %v12347_v13  ;;  %v10501_v59 = vrot.slane %v10487_v57, %v12347_v13  ;;  %v3100_v60 = vpop.f32.mrb[36].mxu1  ;;  %v3171_v61 = vpop.f32.mrb[38].mxu0 }
 0x571   :  { %v3102_v62 = vpop.f32.mrb[37].mxu1  ;;  %v3173_v63 = vpop.f32.mrb[39].mxu0 }
 0x572   :  { %v10502_v0 = vcombine.low %v10494_v58, %v10501_v59  ;;  %v10503_v2 = vcombine.low %v3100_v60, %v3102_v62  ;;  %v10504_v3 = vcombine.low %v3171_v61, %v3173_v63 }
 0x574   :  { %11414 = vst [vmem:[#allocation10 + $0x70] sm:$0xff] %v10502_v0  ;;  %v10511_v4 = vrot.slane %v10503_v2, %v12347_v13  ;;  %v10518_v5 = vrot.slane %v10504_v3, %v12347_v13  ;;  %v3242_v6 = vpop.f32.mrb[38].mxu1  ;;  %v3313_v7 = vpop.f32.mrb[40].mxu0 }
 0x575   :  { %v3244_v8 = vpop.f32.mrb[39].mxu1  ;;  %v3315_v9 = vpop.f32.mrb[41].mxu0 }
 0x576   :  { %v10519_v10 = vcombine.low %v10511_v4, %v10518_v5  ;;  %v10520_v11 = vcombine.low %v3242_v6, %v3244_v8  ;;  %v10521_v12 = vcombine.low %v3313_v7, %v3315_v9 }
 0x578   :  { %11415 = vst [vmem:[#allocation10 + $0x78] sm:$0xff] %v10519_v10  ;;  %v10528_v14 = vrot.slane %v10520_v11, %v12347_v13  ;;  %v10535_v15 = vrot.slane %v10521_v12, %v12347_v13  ;;  %v3384_v16 = vpop.f32.mrb[40].mxu1  ;;  %v3455_v17 = vpop.f32.mrb[42].mxu0 }
 0x579   :  { %v3386_v18 = vpop.f32.mrb[41].mxu1  ;;  %v3457_v19 = vpop.f32.mrb[43].mxu0 }
 0x57a   :  { %v10536_v20 = vcombine.low %v10528_v14, %v10535_v15  ;;  %v10537_v21 = vcombine.low %v3384_v16, %v3386_v18  ;;  %v10538_v22 = vcombine.low %v3455_v17, %v3457_v19 }
 0x57c   :  { %11416 = vst [vmem:[#allocation10 + $0x80] sm:$0xff] %v10536_v20  ;;  %v10545_v1 = vrot.slane %v10537_v21, %v12347_v13  ;;  %v10552_v23 = vrot.slane %v10538_v22, %v12347_v13  ;;  %v3526_v24 = vpop.f32.mrb[42].mxu1  ;;  %v3597_v25 = vpop.f32.mrb[44].mxu0 }
 0x57d   :  { %v3528_v26 = vpop.f32.mrb[43].mxu1  ;;  %v3599_v27 = vpop.f32.mrb[45].mxu0 }
 0x57e   :  { %v10553_v28 = vcombine.low %v10545_v1, %v10552_v23  ;;  %v10554_v29 = vcombine.low %v3526_v24, %v3528_v26  ;;  %v10555_v30 = vcombine.low %v3597_v25, %v3599_v27 }
 0x580   :  { %11417 = vst [vmem:[#allocation10 + $0x88] sm:$0xff] %v10553_v28  ;;  %v10562_v31 = vrot.slane %v10554_v29, %v12347_v13  ;;  %v10569_v41 = vrot.slane %v10555_v30, %v12347_v13  ;;  %v3668_v32 = vpop.f32.mrb[44].mxu1  ;;  %v3739_v33 = vpop.f32.mrb[46].mxu0 }
 0x581   :  { %v3670_v34 = vpop.f32.mrb[45].mxu1  ;;  %v3741_v35 = vpop.f32.mrb[47].mxu0 }
 0x582   :  { %v10570_v36 = vcombine.low %v10562_v31, %v10569_v41  ;;  %v10571_v37 = vcombine.low %v3668_v32, %v3670_v34  ;;  %v10572_v38 = vcombine.low %v3739_v33, %v3741_v35 }
 0x584   :  { %11418 = vst [vmem:[#allocation10 + $0x90] sm:$0xff] %v10570_v36  ;;  %v10579_v39 = vrot.slane %v10571_v37, %v12347_v13  ;;  %v10586_v40 = vrot.slane %v10572_v38, %v12347_v13  ;;  %v3810_v42 = vpop.f32.mrb[46].mxu1  ;;  %v3881_v43 = vpop.f32.mrb[48].mxu0 }
 0x585   :  { %v3812_v44 = vpop.f32.mrb[47].mxu1  ;;  %v3883_v45 = vpop.f32.mrb[49].mxu0 }
 0x586   :  { %v10587_v46 = vcombine.low %v10579_v39, %v10586_v40  ;;  %v10588_v47 = vcombine.low %v3810_v42, %v3812_v44  ;;  %v10589_v48 = vcombine.low %v3881_v43, %v3883_v45 }
 0x588   :  { %11419 = vst [vmem:[#allocation10 + $0x98] sm:$0xff] %v10587_v46  ;;  %v10596_v49 = vrot.slane %v10588_v47, %v12347_v13  ;;  %v10603_v50 = vrot.slane %v10589_v48, %v12347_v13  ;;  %v3952_v51 = vpop.f32.mrb[48].mxu1  ;;  %v4023_v52 = vpop.f32.mrb[50].mxu0 }
 0x589   :  { %v3954_v53 = vpop.f32.mrb[49].mxu1  ;;  %v4025_v54 = vpop.f32.mrb[51].mxu0 }
 0x58a   :  { %v10604_v55 = vcombine.low %v10596_v49, %v10603_v50  ;;  %v10605_v56 = vcombine.low %v3952_v51, %v3954_v53  ;;  %v10606_v57 = vcombine.low %v4023_v52, %v4025_v54 }
 0x58c   :  { %11420 = vst [vmem:[#allocation10 + $0xa0] sm:$0xff] %v10604_v55  ;;  %v10613_v58 = vrot.slane %v10605_v56, %v12347_v13  ;;  %v10620_v59 = vrot.slane %v10606_v57, %v12347_v13  ;;  %v4094_v60 = vpop.f32.mrb[50].mxu1  ;;  %v4165_v61 = vpop.f32.mrb[52].mxu0 }
 0x58d   :  { %v4096_v62 = vpop.f32.mrb[51].mxu1  ;;  %v4167_v63 = vpop.f32.mrb[53].mxu0 }
 0x58e   :  { %v10621_v0 = vcombine.low %v10613_v58, %v10620_v59  ;;  %v10622_v2 = vcombine.low %v4094_v60, %v4096_v62  ;;  %v10623_v3 = vcombine.low %v4165_v61, %v4167_v63 }
 0x590   :  { %11421 = vst [vmem:[#allocation10 + $0xa8] sm:$0xff] %v10621_v0  ;;  %v10630_v4 = vrot.slane %v10622_v2, %v12347_v13  ;;  %v10637_v5 = vrot.slane %v10623_v3, %v12347_v13  ;;  %v4236_v6 = vpop.f32.mrb[52].mxu1  ;;  %v4307_v7 = vpop.f32.mrb[54].mxu0 }
 0x591   :  { %v4238_v8 = vpop.f32.mrb[53].mxu1  ;;  %v4309_v9 = vpop.f32.mrb[55].mxu0 }
 0x592   :  { %v10638_v10 = vcombine.low %v10630_v4, %v10637_v5  ;;  %v10639_v11 = vcombine.low %v4236_v6, %v4238_v8  ;;  %v10640_v12 = vcombine.low %v4307_v7, %v4309_v9 }
 0x594   :  { %11422 = vst [vmem:[#allocation10 + $0xb0] sm:$0xff] %v10638_v10  ;;  %v10647_v14 = vrot.slane %v10639_v11, %v12347_v13  ;;  %v10654_v15 = vrot.slane %v10640_v12, %v12347_v13  ;;  %v4378_v16 = vpop.f32.mrb[54].mxu1  ;;  %v4449_v17 = vpop.f32.mrb[56].mxu0 }
 0x595   :  { %v4380_v18 = vpop.f32.mrb[55].mxu1  ;;  %v4451_v19 = vpop.f32.mrb[57].mxu0 }
 0x596   :  { %v10655_v20 = vcombine.low %v10647_v14, %v10654_v15  ;;  %v10656_v21 = vcombine.low %v4378_v16, %v4380_v18  ;;  %v10657_v22 = vcombine.low %v4449_v17, %v4451_v19 }
 0x598   :  { %11423 = vst [vmem:[#allocation10 + $0xb8] sm:$0xff] %v10655_v20  ;;  %v10664_v1 = vrot.slane %v10656_v21, %v12347_v13  ;;  %v10671_v23 = vrot.slane %v10657_v22, %v12347_v13  ;;  %v4520_v24 = vpop.f32.mrb[56].mxu1  ;;  %v4591_v25 = vpop.f32.mrb[58].mxu0 }
 0x599   :  { %v4522_v26 = vpop.f32.mrb[57].mxu1  ;;  %v4593_v27 = vpop.f32.mrb[59].mxu0 }
 0x59a   :  { %v10672_v28 = vcombine.low %v10664_v1, %v10671_v23  ;;  %v10673_v29 = vcombine.low %v4520_v24, %v4522_v26  ;;  %v10674_v30 = vcombine.low %v4591_v25, %v4593_v27 }
 0x59c   :  { %11424 = vst [vmem:[#allocation10 + $0xc0] sm:$0xff] %v10672_v28  ;;  %v10681_v31 = vrot.slane %v10673_v29, %v12347_v13  ;;  %v10688_v41 = vrot.slane %v10674_v30, %v12347_v13  ;;  %v4662_v32 = vpop.f32.mrb[58].mxu1  ;;  %v4733_v33 = vpop.f32.mrb[60].mxu0 }
 0x59d   :  { %v4664_v34 = vpop.f32.mrb[59].mxu1  ;;  %v4735_v35 = vpop.f32.mrb[61].mxu0 }
 0x59e   :  { %v10689_v36 = vcombine.low %v10681_v31, %v10688_v41  ;;  %v10690_v37 = vcombine.low %v4662_v32, %v4664_v34  ;;  %v10691_v38 = vcombine.low %v4733_v33, %v4735_v35 }
 0x5a0   :  { %11425 = vst [vmem:[#allocation10 + $0xc8] sm:$0xff] %v10689_v36  ;;  %v10698_v39 = vrot.slane %v10690_v37, %v12347_v13  ;;  %v10705_v40 = vrot.slane %v10691_v38, %v12347_v13  ;;  %v4804_v42 = vpop.f32.mrb[60].mxu1  ;;  %v4875_v43 = vpop.f32.mrb[62].mxu0 }
 0x5a1   :  { %v4806_v44 = vpop.f32.mrb[61].mxu1  ;;  %v4877_v45 = vpop.f32.mrb[63].mxu0 }
 0x5a2   :  { %v10706_v46 = vcombine.low %v10698_v39, %v10705_v40  ;;  %v10707_v47 = vcombine.low %v4804_v42, %v4806_v44  ;;  %v10708_v48 = vcombine.low %v4875_v43, %v4877_v45 }
 0x5a4   :  { %11426 = vst [vmem:[#allocation10 + $0xd0] sm:$0xff] %v10706_v46  ;;  %v10715_v49 = vrot.slane %v10707_v47, %v12347_v13  ;;  %v10722_v50 = vrot.slane %v10708_v48, %v12347_v13  ;;  %v4946_v51 = vpop.f32.mrb[62].mxu1  ;;  %v5017_v52 = vpop.f32.mrb[64].mxu0 }
 0x5a5   :  { %v4948_v53 = vpop.f32.mrb[63].mxu1  ;;  %v5019_v54 = vpop.f32.mrb[65].mxu0 }
 0x5a6   :  { %v10723_v55 = vcombine.low %v10715_v49, %v10722_v50  ;;  %v10724_v56 = vcombine.low %v4946_v51, %v4948_v53  ;;  %v10725_v57 = vcombine.low %v5017_v52, %v5019_v54 }
 0x5a8   :  { %11427 = vst [vmem:[#allocation10 + $0xd8] sm:$0xff] %v10723_v55  ;;  %v10732_v58 = vrot.slane %v10724_v56, %v12347_v13  ;;  %v10739_v59 = vrot.slane %v10725_v57, %v12347_v13  ;;  %v5088_v60 = vpop.f32.mrb[64].mxu1  ;;  %v5159_v61 = vpop.f32.mrb[66].mxu0 }
 0x5a9   :  { %v5090_v62 = vpop.f32.mrb[65].mxu1  ;;  %v5161_v63 = vpop.f32.mrb[67].mxu0 }
 0x5aa   :  { %v10740_v0 = vcombine.low %v10732_v58, %v10739_v59  ;;  %v10741_v2 = vcombine.low %v5088_v60, %v5090_v62  ;;  %v10742_v3 = vcombine.low %v5159_v61, %v5161_v63 }
 0x5ac   :  { %11428 = vst [vmem:[#allocation10 + $0xe0] sm:$0xff] %v10740_v0  ;;  %v10749_v4 = vrot.slane %v10741_v2, %v12347_v13  ;;  %v10756_v5 = vrot.slane %v10742_v3, %v12347_v13  ;;  %v5230_v6 = vpop.f32.mrb[66].mxu1  ;;  %v5301_v7 = vpop.f32.mrb[68].mxu0 }
 0x5ad   :  { %v5232_v8 = vpop.f32.mrb[67].mxu1  ;;  %v5303_v9 = vpop.f32.mrb[69].mxu0 }
 0x5ae   :  { %v10757_v10 = vcombine.low %v10749_v4, %v10756_v5  ;;  %v10758_v11 = vcombine.low %v5230_v6, %v5232_v8  ;;  %v10759_v12 = vcombine.low %v5301_v7, %v5303_v9 }
 0x5b0   :  { %11429 = vst [vmem:[#allocation10 + $0xe8] sm:$0xff] %v10757_v10  ;;  %v10766_v14 = vrot.slane %v10758_v11, %v12347_v13  ;;  %v10773_v15 = vrot.slane %v10759_v12, %v12347_v13  ;;  %v5372_v16 = vpop.f32.mrb[68].mxu1  ;;  %v5443_v17 = vpop.f32.mrb[70].mxu0 }
 0x5b1   :  { %v5374_v18 = vpop.f32.mrb[69].mxu1  ;;  %v5445_v19 = vpop.f32.mrb[71].mxu0 }
 0x5b2   :  { %v10774_v20 = vcombine.low %v10766_v14, %v10773_v15  ;;  %v10775_v21 = vcombine.low %v5372_v16, %v5374_v18  ;;  %v10776_v22 = vcombine.low %v5443_v17, %v5445_v19 }
 0x5b4   :  { %11430 = vst [vmem:[#allocation10 + $0xf0] sm:$0xff] %v10774_v20  ;;  %v10783_v1 = vrot.slane %v10775_v21, %v12347_v13  ;;  %v10790_v23 = vrot.slane %v10776_v22, %v12347_v13  ;;  %v5514_v24 = vpop.f32.mrb[70].mxu1  ;;  %v5585_v25 = vpop.f32.mrb[72].mxu0 }
 0x5b5   :  { %v5516_v26 = vpop.f32.mrb[71].mxu1  ;;  %v5587_v27 = vpop.f32.mrb[73].mxu0 }
 0x5b6   :  { %v10791_v28 = vcombine.low %v10783_v1, %v10790_v23  ;;  %v10792_v29 = vcombine.low %v5514_v24, %v5516_v26  ;;  %v10793_v30 = vcombine.low %v5585_v25, %v5587_v27 }
 0x5b8   :  { %11431 = vst [vmem:[#allocation10 + $0xf8] sm:$0xff] %v10791_v28  ;;  %v10800_v31 = vrot.slane %v10792_v29, %v12347_v13  ;;  %v10807_v41 = vrot.slane %v10793_v30, %v12347_v13  ;;  %v5656_v32 = vpop.f32.mrb[72].mxu1  ;;  %v5727_v33 = vpop.f32.mrb[74].mxu0 }
 0x5b9   :  { %11781 = shalt.err (!%p11778_p6)
}
 0x5ba   :  { %s11782_s16 = scalar_lea.hbm %s12590_s13, 32 }
 0x5bb   :  { %p11783_p7 = scmp.ne.s32.totalorder %s12590_s13, %s11782_s16  ;;  %p11786_p8 = scmp.lt.u32.totalorder %s11782_s16, %s12590_s13 }
 0x5bd   :  { %p11788_p9 = pnand %p11786_p8, %p11783_p7 }
 0x5bf   :  { %11791 = shalt.err (!%p11788_p9)
}
 0x5c0   :  { %11483 = dma.vmem_to_hbm [thread:$0]  %s11481_s20, 32, %s12590_s13, [#allocation9]   ;;  %v5658_v34 = vpop.f32.mrb[73].mxu1  ;;  %v5729_v35 = vpop.f32.mrb[75].mxu0  ;;  %v10808_v36 = vcombine.low %v10800_v31, %v10807_v41 }
 0x5c1   :  { %v10809_v37 = vcombine.low %v5656_v32, %v5658_v34  ;;  %v10810_v38 = vcombine.low %v5727_v33, %v5729_v35  ;;  %s11792_s4 = scalar_lea.vmem %s11471_s30, 32  ;;  %p11797_p11 = scmp.lt.s32.totalorder %s11471_s30, %s11471_s30 }
 0x5c2   :  { %p11793_p10 = scmp.ne.s32.totalorder %s11471_s30, %s11792_s4  ;;  %p11798_p12 = scmp.lt.s32.totalorder %s11792_s4, %s11792_s4 }
 0x5c4   :  { %p11799_p13 = por %p11798_p12, %p11797_p11 }
 0x5c6   :  { %p11800_p0 = pnand %p11799_p13, %p11793_p10 }
 0x5c8   :  { %11803 = shalt.err (!%p11800_p0)
}
 0x5c9   :  { %s11804_s3 = scalar_lea.hbm %s12589_s12, 32 }
 0x5ca   :  { %p11805_p1 = scmp.ne.s32.totalorder %s12589_s12, %s11804_s3  ;;  %p11808_p2 = scmp.lt.u32.totalorder %s11804_s3, %s12589_s12 }
 0x5cc   :  { %p11810_p3 = pnand %p11808_p2, %p11805_p1 }
 0x5ce   :  { %11813 = shalt.err (!%p11810_p3)
}
 0x5cf   :  { %11473 = dma.vmem_to_hbm [thread:$0]  %s11471_s30, 32, %s12589_s12, [#allocation4]   ;;  %11432 = vst [vmem:[#allocation10 + $0x100] sm:$0xff] %v10808_v36  ;;  %v10817_v39 = vrot.slane %v10809_v37, %v12347_v13  ;;  %v10824_v40 = vrot.slane %v10810_v38, %v12347_v13  ;;  %v5798_v42 = vpop.f32.mrb[74].mxu1  ;;  %v5869_v43 = vpop.f32.mrb[76].mxu0 }
 0x5d0   :  { %v5800_v44 = vpop.f32.mrb[75].mxu1  ;;  %v5871_v45 = vpop.f32.mrb[77].mxu0  ;;  %s11852_s12 = smov [#allocation10]  }
 0x5d1   :  { %v10825_v46 = vcombine.low %v10817_v39, %v10824_v40  ;;  %v10826_v47 = vcombine.low %v5798_v42, %v5800_v44  ;;  %v10827_v48 = vcombine.low %v5869_v43, %v5871_v45  ;;  %v5940_v51 = vpop.f32.mrb[76].mxu1  ;;  %v6011_v52 = vpop.f32.mrb[78].mxu0  ;;  %s11490_s7 = sshll.u32 %s11852_s12, 4  ;;  %s11491_s7 = int_to_ptr.vmem [resolvable:$true] %s11490_s7 }
 0x5d2   :  { %v5942_v53 = vpop.f32.mrb[77].mxu1  ;;  %v6013_v54 = vpop.f32.mrb[79].mxu0  ;;  %s11814_s5 = scalar_lea.vmem %s11491_s7, 8192  ;;  %p11819_p5 = scmp.lt.s32.totalorder %s11491_s7, %s11491_s7 }
 0x5d3   :  { %11433 = vst [vmem:[#allocation10 + $0x108] sm:$0xff] %v10825_v46  ;;  %v10834_v49 = vrot.slane %v10826_v47, %v12347_v13  ;;  %v10841_v50 = vrot.slane %v10827_v48, %v12347_v13  ;;  %v10843_v56 = vcombine.low %v5940_v51, %v5942_v53  ;;  %v10844_v57 = vcombine.low %v6011_v52, %v6013_v54  ;;  %v6082_v60 = vpop.f32.mrb[78].mxu1  ;;  %v6153_v61 = vpop.f32.mrb[80].mxu0  ;;  %p11815_p4 = scmp.ne.s32.totalorder %s11491_s7, %s11814_s5  ;;  %p11820_p6 = scmp.lt.s32.totalorder %s11814_s5, %s11814_s5 }
 0x5d4   :  { %v6084_v62 = vpop.f32.mrb[79].mxu1  ;;  %v6155_v63 = vpop.f32.mrb[81].mxu0 }
 0x5d5   :  { %v10842_v55 = vcombine.low %v10834_v49, %v10841_v50  ;;  %v10851_v58 = vrot.slane %v10843_v56, %v12347_v13  ;;  %v10858_v59 = vrot.slane %v10844_v57, %v12347_v13  ;;  %v10860_v2 = vcombine.low %v6082_v60, %v6084_v62  ;;  %v6224_v6 = vpop.f32.mrb[80].mxu1  ;;  %v6295_v7 = vpop.f32.mrb[82].mxu0  ;;  %p11821_p7 = por %p11820_p6, %p11819_p5 }
 0x5d6   :  { %v10861_v3 = vcombine.low %v6153_v61, %v6155_v63  ;;  %v6226_v8 = vpop.f32.mrb[81].mxu1  ;;  %v6297_v9 = vpop.f32.mrb[83].mxu0 }
 0x5d7   :  { %11434 = vst [vmem:[#allocation10 + $0x110] sm:$0xff] %v10842_v55  ;;  %v10859_v0 = vcombine.low %v10851_v58, %v10858_v59  ;;  %v10868_v4 = vrot.slane %v10860_v2, %v12347_v13  ;;  %v10877_v11 = vcombine.low %v6224_v6, %v6226_v8  ;;  %v10878_v12 = vcombine.low %v6295_v7, %v6297_v9  ;;  %v6366_v16 = vpop.f32.mrb[82].mxu1  ;;  %v6437_v17 = vpop.f32.mrb[84].mxu0  ;;  %p11822_p8 = pnand %p11821_p7, %p11815_p4 }
 0x5d8   :  { %v10875_v5 = vrot.slane %v10861_v3, %v12347_v13  ;;  %v6368_v18 = vpop.f32.mrb[83].mxu1  ;;  %v6439_v19 = vpop.f32.mrb[85].mxu0 }
 0x5d9   :  { %11435 = vst [vmem:[#allocation10 + $0x118] sm:$0xff] %v10859_v0  ;;  %v10885_v14 = vrot.slane %v10877_v11, %v12347_v13  ;;  %v10892_v15 = vrot.slane %v10878_v12, %v12347_v13  ;;  %v10894_v21 = vcombine.low %v6366_v16, %v6368_v18  ;;  %v10895_v22 = vcombine.low %v6437_v17, %v6439_v19  ;;  %v6508_v24 = vpop.f32.mrb[84].mxu1  ;;  %v6579_v25 = vpop.f32.mrb[86].mxu0 }
 0x5da   :  { %v10876_v10 = vcombine.low %v10868_v4, %v10875_v5  ;;  %v6510_v26 = vpop.f32.mrb[85].mxu1  ;;  %v6581_v27 = vpop.f32.mrb[87].mxu0 }
 0x5db   :  { %v10893_v20 = vcombine.low %v10885_v14, %v10892_v15  ;;  %v10902_v1 = vrot.slane %v10894_v21, %v12347_v13  ;;  %v10909_v23 = vrot.slane %v10895_v22, %v12347_v13  ;;  %v10911_v29 = vcombine.low %v6508_v24, %v6510_v26  ;;  %v6650_v32 = vpop.f32.mrb[86].mxu1  ;;  %v6721_v33 = vpop.f32.mrb[88].mxu0 }
 0x5dc   :  { %11436 = vst [vmem:[#allocation10 + $0x120] sm:$0xff] %v10876_v10  ;;  %v10912_v30 = vcombine.low %v6579_v25, %v6581_v27  ;;  %v6652_v34 = vpop.f32.mrb[87].mxu1  ;;  %v6723_v35 = vpop.f32.mrb[89].mxu0 }
 0x5dd   :  { %11437 = vst [vmem:[#allocation10 + $0x128] sm:$0xff] %v10893_v20  ;;  %v10910_v28 = vcombine.low %v10902_v1, %v10909_v23  ;;  %v10919_v31 = vrot.slane %v10911_v29, %v12347_v13  ;;  %v10928_v37 = vcombine.low %v6650_v32, %v6652_v34  ;;  %v10929_v38 = vcombine.low %v6721_v33, %v6723_v35  ;;  %v6792_v42 = vpop.f32.mrb[88].mxu1  ;;  %v6863_v43 = vpop.f32.mrb[90].mxu0 }
 0x5de   :  { %v10926_v41 = vrot.slane %v10912_v30, %v12347_v13  ;;  %v6794_v44 = vpop.f32.mrb[89].mxu1  ;;  %v6865_v45 = vpop.f32.mrb[91].mxu0 }
 0x5df   :  { %11438 = vst [vmem:[#allocation10 + $0x130] sm:$0xff] %v10910_v28  ;;  %v10936_v39 = vrot.slane %v10928_v37, %v12347_v13  ;;  %v10943_v40 = vrot.slane %v10929_v38, %v12347_v13  ;;  %v10945_v47 = vcombine.low %v6792_v42, %v6794_v44  ;;  %v10946_v48 = vcombine.low %v6863_v43, %v6865_v45  ;;  %v6934_v51 = vpop.f32.mrb[90].mxu1  ;;  %v7005_v52 = vpop.f32.mrb[92].mxu0 }
 0x5e0   :  { %v10927_v36 = vcombine.low %v10919_v31, %v10926_v41  ;;  %v6936_v53 = vpop.f32.mrb[91].mxu1  ;;  %v7007_v54 = vpop.f32.mrb[93].mxu0 }
 0x5e1   :  { %v10944_v46 = vcombine.low %v10936_v39, %v10943_v40  ;;  %v10953_v49 = vrot.slane %v10945_v47, %v12347_v13  ;;  %v10960_v50 = vrot.slane %v10946_v48, %v12347_v13  ;;  %v10962_v56 = vcombine.low %v6934_v51, %v6936_v53  ;;  %v7076_v60 = vpop.f32.mrb[92].mxu1  ;;  %v7147_v61 = vpop.f32.mrb[94].mxu0 }
 0x5e2   :  { %11439 = vst [vmem:[#allocation10 + $0x138] sm:$0xff] %v10927_v36  ;;  %v10963_v57 = vcombine.low %v7005_v52, %v7007_v54  ;;  %v7078_v62 = vpop.f32.mrb[93].mxu1  ;;  %v7149_v63 = vpop.f32.mrb[95].mxu0 }
 0x5e3   :  { %11440 = vst [vmem:[#allocation10 + $0x140] sm:$0xff] %v10944_v46  ;;  %v10961_v55 = vcombine.low %v10953_v49, %v10960_v50  ;;  %v10970_v58 = vrot.slane %v10962_v56, %v12347_v13  ;;  %v10979_v2 = vcombine.low %v7076_v60, %v7078_v62  ;;  %v10980_v3 = vcombine.low %v7147_v61, %v7149_v63 }
 0x5e4   :  { %v10977_v59 = vrot.slane %v10963_v57, %v12347_v13  ;;  %v7218_v6 = vpop.f32.mrb[94].mxu1  ;;  %v7289_v7 = vpop.f32.mrb[96].mxu0 }
 0x5e5   :  { %11441 = vst [vmem:[#allocation10 + $0x148] sm:$0xff] %v10961_v55  ;;  %v10987_v4 = vrot.slane %v10979_v2, %v12347_v13  ;;  %v10994_v5 = vrot.slane %v10980_v3, %v12347_v13  ;;  %v7220_v8 = vpop.f32.mrb[95].mxu1  ;;  %v7291_v9 = vpop.f32.mrb[97].mxu0 }
 0x5e6   :  { %v10978_v0 = vcombine.low %v10970_v58, %v10977_v59  ;;  %v10996_v11 = vcombine.low %v7218_v6, %v7220_v8  ;;  %v10997_v12 = vcombine.low %v7289_v7, %v7291_v9 }
 0x5e7   :  { %v10995_v10 = vcombine.low %v10987_v4, %v10994_v5 }
 0x5e8   :  { %11442 = vst [vmem:[#allocation10 + $0x150] sm:$0xff] %v10978_v0  ;;  %v11004_v14 = vrot.slane %v10996_v11, %v12347_v13  ;;  %v11011_v15 = vrot.slane %v10997_v12, %v12347_v13  ;;  %v7360_v16 = vpop.f32.mrb[96].mxu1  ;;  %v7431_v17 = vpop.f32.mrb[98].mxu0 }
 0x5e9   :  { %11443 = vst [vmem:[#allocation10 + $0x158] sm:$0xff] %v10995_v10  ;;  %v7362_v18 = vpop.f32.mrb[97].mxu1  ;;  %v7433_v19 = vpop.f32.mrb[99].mxu0 }
 0x5ea   :  { %v11012_v20 = vcombine.low %v11004_v14, %v11011_v15  ;;  %v11013_v21 = vcombine.low %v7360_v16, %v7362_v18  ;;  %v11014_v22 = vcombine.low %v7431_v17, %v7433_v19 }
 0x5ec   :  { %11444 = vst [vmem:[#allocation10 + $0x160] sm:$0xff] %v11012_v20  ;;  %v11021_v1 = vrot.slane %v11013_v21, %v12347_v13  ;;  %v11028_v23 = vrot.slane %v11014_v22, %v12347_v13  ;;  %v7502_v24 = vpop.f32.mrb[98].mxu1  ;;  %v7573_v25 = vpop.f32.mrb[100].mxu0 }
 0x5ed   :  { %v7504_v26 = vpop.f32.mrb[99].mxu1  ;;  %v7575_v27 = vpop.f32.mrb[101].mxu0 }
 0x5ee   :  { %v11029_v28 = vcombine.low %v11021_v1, %v11028_v23  ;;  %v11030_v29 = vcombine.low %v7502_v24, %v7504_v26  ;;  %v11031_v30 = vcombine.low %v7573_v25, %v7575_v27 }
 0x5f0   :  { %11445 = vst [vmem:[#allocation10 + $0x168] sm:$0xff] %v11029_v28  ;;  %v11038_v31 = vrot.slane %v11030_v29, %v12347_v13  ;;  %v11045_v41 = vrot.slane %v11031_v30, %v12347_v13  ;;  %v7644_v32 = vpop.f32.mrb[100].mxu1  ;;  %v7715_v33 = vpop.f32.mrb[102].mxu0 }
 0x5f1   :  { %v7646_v34 = vpop.f32.mrb[101].mxu1  ;;  %v7717_v35 = vpop.f32.mrb[103].mxu0 }
 0x5f2   :  { %v11046_v36 = vcombine.low %v11038_v31, %v11045_v41  ;;  %v11047_v37 = vcombine.low %v7644_v32, %v7646_v34  ;;  %v11048_v38 = vcombine.low %v7715_v33, %v7717_v35 }
 0x5f4   :  { %11446 = vst [vmem:[#allocation10 + $0x170] sm:$0xff] %v11046_v36  ;;  %v11055_v39 = vrot.slane %v11047_v37, %v12347_v13  ;;  %v11062_v40 = vrot.slane %v11048_v38, %v12347_v13  ;;  %v7786_v42 = vpop.f32.mrb[102].mxu1  ;;  %v7857_v43 = vpop.f32.mrb[104].mxu0 }
 0x5f5   :  { %v7788_v44 = vpop.f32.mrb[103].mxu1  ;;  %v7859_v45 = vpop.f32.mrb[105].mxu0 }
 0x5f6   :  { %v11063_v46 = vcombine.low %v11055_v39, %v11062_v40  ;;  %v11064_v47 = vcombine.low %v7786_v42, %v7788_v44  ;;  %v11065_v48 = vcombine.low %v7857_v43, %v7859_v45 }
 0x5f8   :  { %11447 = vst [vmem:[#allocation10 + $0x178] sm:$0xff] %v11063_v46  ;;  %v11072_v49 = vrot.slane %v11064_v47, %v12347_v13  ;;  %v11079_v50 = vrot.slane %v11065_v48, %v12347_v13  ;;  %v7928_v51 = vpop.f32.mrb[104].mxu1  ;;  %v7999_v52 = vpop.f32.mrb[106].mxu0 }
 0x5f9   :  { %v7930_v53 = vpop.f32.mrb[105].mxu1  ;;  %v8001_v54 = vpop.f32.mrb[107].mxu0 }
 0x5fa   :  { %v11080_v55 = vcombine.low %v11072_v49, %v11079_v50  ;;  %v11081_v56 = vcombine.low %v7928_v51, %v7930_v53  ;;  %v11082_v57 = vcombine.low %v7999_v52, %v8001_v54 }
 0x5fc   :  { %11448 = vst [vmem:[#allocation10 + $0x180] sm:$0xff] %v11080_v55  ;;  %v11089_v58 = vrot.slane %v11081_v56, %v12347_v13  ;;  %v11096_v59 = vrot.slane %v11082_v57, %v12347_v13  ;;  %v8070_v60 = vpop.f32.mrb[106].mxu1  ;;  %v8141_v61 = vpop.f32.mrb[108].mxu0 }
 0x5fd   :  { %v8072_v62 = vpop.f32.mrb[107].mxu1  ;;  %v8143_v63 = vpop.f32.mrb[109].mxu0 }
 0x5fe   :  { %v11097_v0 = vcombine.low %v11089_v58, %v11096_v59  ;;  %v11098_v2 = vcombine.low %v8070_v60, %v8072_v62  ;;  %v11099_v3 = vcombine.low %v8141_v61, %v8143_v63 }
 0x600   :  { %11449 = vst [vmem:[#allocation10 + $0x188] sm:$0xff] %v11097_v0  ;;  %v11106_v4 = vrot.slane %v11098_v2, %v12347_v13  ;;  %v11113_v5 = vrot.slane %v11099_v3, %v12347_v13  ;;  %v8212_v6 = vpop.f32.mrb[108].mxu1  ;;  %v8283_v7 = vpop.f32.mrb[110].mxu0 }
 0x601   :  { %v8214_v8 = vpop.f32.mrb[109].mxu1  ;;  %v8285_v9 = vpop.f32.mrb[111].mxu0 }
 0x602   :  { %v11114_v10 = vcombine.low %v11106_v4, %v11113_v5  ;;  %v11115_v11 = vcombine.low %v8212_v6, %v8214_v8  ;;  %v11116_v12 = vcombine.low %v8283_v7, %v8285_v9 }
 0x604   :  { %11450 = vst [vmem:[#allocation10 + $0x190] sm:$0xff] %v11114_v10  ;;  %v11123_v14 = vrot.slane %v11115_v11, %v12347_v13  ;;  %v11130_v15 = vrot.slane %v11116_v12, %v12347_v13  ;;  %v8354_v16 = vpop.f32.mrb[110].mxu1  ;;  %v8425_v17 = vpop.f32.mrb[112].mxu0 }
 0x605   :  { %v8356_v18 = vpop.f32.mrb[111].mxu1  ;;  %v8427_v19 = vpop.f32.mrb[113].mxu0 }
 0x606   :  { %v11131_v20 = vcombine.low %v11123_v14, %v11130_v15  ;;  %v11132_v21 = vcombine.low %v8354_v16, %v8356_v18  ;;  %v11133_v22 = vcombine.low %v8425_v17, %v8427_v19 }
 0x608   :  { %11451 = vst [vmem:[#allocation10 + $0x198] sm:$0xff] %v11131_v20  ;;  %v11140_v1 = vrot.slane %v11132_v21, %v12347_v13  ;;  %v11147_v23 = vrot.slane %v11133_v22, %v12347_v13  ;;  %v8496_v24 = vpop.f32.mrb[112].mxu1  ;;  %v8567_v25 = vpop.f32.mrb[114].mxu0 }
 0x609   :  { %v8498_v26 = vpop.f32.mrb[113].mxu1  ;;  %v8569_v27 = vpop.f32.mrb[115].mxu0 }
 0x60a   :  { %v11148_v28 = vcombine.low %v11140_v1, %v11147_v23  ;;  %v11149_v29 = vcombine.low %v8496_v24, %v8498_v26  ;;  %v11150_v30 = vcombine.low %v8567_v25, %v8569_v27 }
 0x60c   :  { %11452 = vst [vmem:[#allocation10 + $0x1a0] sm:$0xff] %v11148_v28  ;;  %v11157_v31 = vrot.slane %v11149_v29, %v12347_v13  ;;  %v11164_v41 = vrot.slane %v11150_v30, %v12347_v13  ;;  %v8638_v32 = vpop.f32.mrb[114].mxu1  ;;  %v8709_v33 = vpop.f32.mrb[116].mxu0 }
 0x60d   :  { %v8640_v34 = vpop.f32.mrb[115].mxu1  ;;  %v8711_v35 = vpop.f32.mrb[117].mxu0 }
 0x60e   :  { %v11165_v36 = vcombine.low %v11157_v31, %v11164_v41  ;;  %v11166_v37 = vcombine.low %v8638_v32, %v8640_v34  ;;  %v11167_v38 = vcombine.low %v8709_v33, %v8711_v35 }
 0x610   :  { %11453 = vst [vmem:[#allocation10 + $0x1a8] sm:$0xff] %v11165_v36  ;;  %v11174_v39 = vrot.slane %v11166_v37, %v12347_v13  ;;  %v11181_v40 = vrot.slane %v11167_v38, %v12347_v13  ;;  %v8780_v42 = vpop.f32.mrb[116].mxu1  ;;  %v8851_v43 = vpop.f32.mrb[118].mxu0 }
 0x611   :  { %v8782_v44 = vpop.f32.mrb[117].mxu1  ;;  %v8853_v45 = vpop.f32.mrb[119].mxu0 }
 0x612   :  { %v11182_v46 = vcombine.low %v11174_v39, %v11181_v40  ;;  %v11183_v47 = vcombine.low %v8780_v42, %v8782_v44  ;;  %v11184_v48 = vcombine.low %v8851_v43, %v8853_v45 }
 0x614   :  { %11454 = vst [vmem:[#allocation10 + $0x1b0] sm:$0xff] %v11182_v46  ;;  %v11191_v49 = vrot.slane %v11183_v47, %v12347_v13  ;;  %v11198_v50 = vrot.slane %v11184_v48, %v12347_v13  ;;  %v8922_v51 = vpop.f32.mrb[118].mxu1  ;;  %v8993_v52 = vpop.f32.mrb[120].mxu0 }
 0x615   :  { %v8924_v53 = vpop.f32.mrb[119].mxu1  ;;  %v8995_v54 = vpop.f32.mrb[121].mxu0 }
 0x616   :  { %v11199_v55 = vcombine.low %v11191_v49, %v11198_v50  ;;  %v11200_v56 = vcombine.low %v8922_v51, %v8924_v53  ;;  %v11201_v57 = vcombine.low %v8993_v52, %v8995_v54 }
 0x618   :  { %11455 = vst [vmem:[#allocation10 + $0x1b8] sm:$0xff] %v11199_v55  ;;  %v11208_v58 = vrot.slane %v11200_v56, %v12347_v13  ;;  %v11215_v59 = vrot.slane %v11201_v57, %v12347_v13  ;;  %v9064_v60 = vpop.f32.mrb[120].mxu1  ;;  %v9135_v61 = vpop.f32.mrb[122].mxu0 }
 0x619   :  { %v9066_v62 = vpop.f32.mrb[121].mxu1  ;;  %v9137_v63 = vpop.f32.mrb[123].mxu0 }
 0x61a   :  { %v11216_v0 = vcombine.low %v11208_v58, %v11215_v59  ;;  %v11217_v2 = vcombine.low %v9064_v60, %v9066_v62  ;;  %v11218_v3 = vcombine.low %v9135_v61, %v9137_v63 }
 0x61c   :  { %11456 = vst [vmem:[#allocation10 + $0x1c0] sm:$0xff] %v11216_v0  ;;  %v11225_v4 = vrot.slane %v11217_v2, %v12347_v13  ;;  %v11232_v5 = vrot.slane %v11218_v3, %v12347_v13  ;;  %v9206_v6 = vpop.f32.mrb[122].mxu1  ;;  %v9277_v7 = vpop.f32.mrb[124].mxu0 }
 0x61d   :  { %v9208_v8 = vpop.f32.mrb[123].mxu1  ;;  %v9279_v9 = vpop.f32.mrb[125].mxu0 }
 0x61e   :  { %v11233_v10 = vcombine.low %v11225_v4, %v11232_v5  ;;  %v11234_v11 = vcombine.low %v9206_v6, %v9208_v8  ;;  %v11235_v12 = vcombine.low %v9277_v7, %v9279_v9 }
 0x620   :  { %11457 = vst [vmem:[#allocation10 + $0x1c8] sm:$0xff] %v11233_v10  ;;  %v11242_v14 = vrot.slane %v11234_v11, %v12347_v13  ;;  %v11249_v15 = vrot.slane %v11235_v12, %v12347_v13  ;;  %v9348_v16 = vpop.f32.mrb[124].mxu1  ;;  %v9419_v17 = vpop.f32.mrb[126].mxu0 }
 0x621   :  { %v9350_v18 = vpop.f32.mrb[125].mxu1  ;;  %v9421_v19 = vpop.f32.mrb[127].mxu0 }
 0x622   :  { %v11250_v20 = vcombine.low %v11242_v14, %v11249_v15  ;;  %v11251_v21 = vcombine.low %v9348_v16, %v9350_v18  ;;  %v11252_v22 = vcombine.low %v9419_v17, %v9421_v19 }
 0x624   :  { %11458 = vst [vmem:[#allocation10 + $0x1d0] sm:$0xff] %v11250_v20  ;;  %v11259_v1 = vrot.slane %v11251_v21, %v12347_v13  ;;  %v11266_v23 = vrot.slane %v11252_v22, %v12347_v13  ;;  %v9490_v24 = vpop.f32.mrb[126].mxu1  ;;  %v9561_v25 = vpop.f32.mrb[128].mxu0 }
 0x625   :  { %v9492_v26 = vpop.f32.mrb[127].mxu1  ;;  %v9563_v27 = vpop.f32.mrb[129].mxu0 }
 0x626   :  { %v11267_v28 = vcombine.low %v11259_v1, %v11266_v23  ;;  %v11268_v29 = vcombine.low %v9490_v24, %v9492_v26  ;;  %v11269_v30 = vcombine.low %v9561_v25, %v9563_v27 }
 0x628   :  { %11459 = vst [vmem:[#allocation10 + $0x1d8] sm:$0xff] %v11267_v28  ;;  %v11276_v31 = vrot.slane %v11268_v29, %v12347_v13  ;;  %v11283_v41 = vrot.slane %v11269_v30, %v12347_v13  ;;  %v9632_v32 = vpop.f32.mrb[128].mxu1  ;;  %v9703_v33 = vpop.f32.mrb[130].mxu0 }
 0x629   :  { %v9634_v34 = vpop.f32.mrb[129].mxu1  ;;  %v9705_v35 = vpop.f32.mrb[131].mxu0 }
 0x62a   :  { %v11284_v36 = vcombine.low %v11276_v31, %v11283_v41  ;;  %v11285_v37 = vcombine.low %v9632_v32, %v9634_v34  ;;  %v11286_v38 = vcombine.low %v9703_v33, %v9705_v35 }
 0x62c   :  { %11460 = vst [vmem:[#allocation10 + $0x1e0] sm:$0xff] %v11284_v36  ;;  %v11293_v39 = vrot.slane %v11285_v37, %v12347_v13  ;;  %v11300_v40 = vrot.slane %v11286_v38, %v12347_v13  ;;  %v9774_v42 = vpop.f32.mrb[130].mxu1  ;;  %v9845_v43 = vpop.f32.mrb[132].mxu0 }
 0x62d   :  { %v9776_v44 = vpop.f32.mrb[131].mxu1  ;;  %v9847_v45 = vpop.f32.mrb[133].mxu0 }
 0x62e   :  { %v11301_v46 = vcombine.low %v11293_v39, %v11300_v40  ;;  %v11302_v47 = vcombine.low %v9774_v42, %v9776_v44  ;;  %v11303_v48 = vcombine.low %v9845_v43, %v9847_v45 }
 0x630   :  { %11461 = vst [vmem:[#allocation10 + $0x1e8] sm:$0xff] %v11301_v46  ;;  %v11310_v49 = vrot.slane %v11302_v47, %v12347_v13  ;;  %v11317_v50 = vrot.slane %v11303_v48, %v12347_v13  ;;  %v9916_v51 = vpop.f32.mrb[132].mxu1  ;;  %v9987_v52 = vpop.f32.mrb[134].mxu0 }
 0x631   :  { %v9918_v53 = vpop.f32.mrb[133].mxu1  ;;  %v9989_v54 = vpop.f32.mrb[135].mxu0 }
 0x632   :  { %v11318_v55 = vcombine.low %v11310_v49, %v11317_v50  ;;  %v11319_v56 = vcombine.low %v9916_v51, %v9918_v53  ;;  %v11320_v57 = vcombine.low %v9987_v52, %v9989_v54 }
 0x634   :  { %11462 = vst [vmem:[#allocation10 + $0x1f0] sm:$0xff] %v11318_v55  ;;  %v11327_v58 = vrot.slane %v11319_v56, %v12347_v13  ;;  %v11334_v59 = vrot.slane %v11320_v57, %v12347_v13 }
 0x636   :  { %v11335_v60 = vcombine.low %v11327_v58, %v11334_v59 }
 0x638   :  { %11463 = vst [vmem:[#allocation10 + $0x1f8] sm:$0xff] %v11335_v60 }
 0x639   :  { %11825 = shalt.err (!%p11822_p8)
}
 0x63a   :  { %s11826_s10 = scalar_lea.hbm %s12591_s14, 8192 }
 0x63b   :  { %p11827_p9 = scmp.ne.s32.totalorder %s12591_s14, %s11826_s10  ;;  %p11830_p10 = scmp.lt.u32.totalorder %s11826_s10, %s12591_s14 }
 0x63d   :  { %p11832_p11 = pnand %p11830_p10, %p11827_p9 }
 0x63f   :  { %11835 = shalt.err (!%p11832_p11)
}
 0x640   :  { %11493 = dma.vmem_to_hbm [thread:$0]  %s11491_s7, 8192, %s12591_s14, [#allocation9]  }
 0x641   :  { %11840 = dma.done.wait [#allocation4], 32  }
 0x642   :  { %11841 = vsyncadd [#allocation4], 4294967264 }
 0x643   :  { %11842 = dma.done.wait [#allocation9], 8224  }
 0x644   :  { %11843 = vsyncadd [#allocation9], 4294959072 }
 0x645   :  { %11503 = vsyncpa [#allocation3], 1 }
 0x646   :  { %11504 = vsyncpa [#allocation6], 1 }
 0x647   :  { %11505 = vsyncpa [#allocation4], 1 }
 0x648   :  { %11506 = vsyncpa [#allocation9], 1 }

</bundles_post_ra>
